<compile_context>
chip_gen: v7x
topology: tpu7x:2x2x1
jax: 0.10.0
libtpu: 0.0.40
codegen_flags: <defaults>
</compile_context>

<pallas_src>
import functools

import jax
import jax.numpy as jnp
from jax.experimental import pallas as pl
from jax.experimental.pallas import tpu as pltpu


def _fractal_block_kernel(W, x_ref, m_ref, w1_ref, w2_ref, w3_ref, w4_ref,
                          b_ref, o_ref):
    """Fused BasicBlock3 forward for one batch image.

    x_ref : (1, Cin0, H*W)      input image, channels on sublanes, spatial on lanes
    m_ref : (4, C_max, H*W)     0/1 border masks: [left(dx=-1), right(dx=+1),
                                up(dy=-1), down(dy=+1)], pre-broadcast on sublanes
    wK_ref: (9, CoutK, CinK)    BN-scale-folded conv taps for stage K (t = ky*3+kx)
    b_ref : (C_total, 1)        folded per-channel bias (all four stages concatenated)
    o_ref : (1, C_total, H*W)   concat([d1, d2, d3, d4]) along channels
    """
    HW = x_ref.shape[2]

    # Load the four edge masks once; they are reused by all four stages.
    m_left = m_ref[0]     # valid where w-1 >= 0   (dx = -1)
    m_right = m_ref[1]    # valid where w+1 <  W   (dx = +1)
    m_up = m_ref[2]       # valid where h-1 >= 0   (dy = -1)
    m_down = m_ref[3]     # valid where h+1 <  H   (dy = +1)

    def conv_bn_relu(v, w_ref, b_off):
        """v: (Cin, HW) f32 activation; returns (Cout, HW) f32 after bias+ReLU."""
        cin = v.shape[0]
        cout = w_ref.shape[1]
        bias = b_ref[b_off:b_off + cout, :]                        # (Cout, 1)

        # Horizontal taps, computed once and shared by the three kernel rows:
        #   h[kx][:, s] = v[:, s + (kx-1)], zeroed outside the image.
        #   (pltpu.roll follows jnp.roll semantics: result[s] = v[s - shift mod HW].)
        h_taps = [
            pltpu.roll(v, 1, axis=1) * m_left[:cin, :],            # dx = -1
            v,                                                     # dx =  0
            pltpu.roll(v, HW - 1, axis=1) * m_right[:cin, :],      # dx = +1
        ]

        out = None
        for ky in range(3):
            r = jnp.dot(w_ref[3 * ky + 0], h_taps[0],
                        preferred_element_type=jnp.float32)
            r = r + jnp.dot(w_ref[3 * ky + 1], h_taps[1],
                            preferred_element_type=jnp.float32)
            r = r + jnp.dot(w_ref[3 * ky + 2], h_taps[2],
                            preferred_element_type=jnp.float32)
            # Vertical shift of the per-row partial result (lane rotation commutes
            # with the channel matmul), masked at the top/bottom image border.
            if ky == 0:                                            # dy = -1
                r = pltpu.roll(r, W, axis=1) * m_up[:cout, :]
            elif ky == 2:                                          # dy = +1
                r = pltpu.roll(r, HW - W, axis=1) * m_down[:cout, :]
            out = r if out is None else out + r
        return jnp.maximum(out + bias, 0.0)                        # folded BN + ReLU

    x = x_ref[0]                                                   # (Cin0, HW)
    c1 = w1_ref.shape[1]
    c2 = w2_ref.shape[1]
    c3 = w3_ref.shape[1]
    c4 = w4_ref.shape[1]

    # Progressive concat: each stage writes its channel slice of the output block,
    # and later stages read the growing channel prefix straight from VMEM.
    d1 = conv_bn_relu(x, w1_ref, 0)
    o_ref[0, 0:c1, :] = d1
    d2 = conv_bn_relu(d1, w2_ref, c1)
    o_ref[0, c1:c1 + c2, :] = d2
    d12 = o_ref[0, 0:c1 + c2, :]
    d3 = conv_bn_relu(d12, w3_ref, c1 + c2)
    o_ref[0, c1 + c2:c1 + c2 + c3, :] = d3
    d123 = o_ref[0, 0:c1 + c2 + c3, :]
    d4 = conv_bn_relu(d123, w4_ref, c1 + c2 + c3)
    o_ref[0, c1 + c2 + c3:c1 + c2 + c3 + c4, :] = d4


def _make_edge_masks(H, W, c_max):
    """(4, c_max, H*W) f32 0/1 masks, pre-broadcast over sublanes.

    Row 0: left  neighbour valid (w-1 >= 0)   -> used for dx = -1
    Row 1: right neighbour valid (w+1 <  W)   -> used for dx = +1
    Row 2: upper neighbour valid (h-1 >= 0)   -> used for dy = -1
    Row 3: lower neighbour valid (h+1 <  H)   -> used for dy = +1
    """
    idx = jnp.arange(H * W, dtype=jnp.int32)
    hh = idx // W
    ww = idx % W
    m = jnp.stack([
        (ww >= 1).astype(jnp.float32),
        (ww <= W - 2).astype(jnp.float32),
        (hh >= 1).astype(jnp.float32),
        (hh <= H - 2).astype(jnp.float32),
    ], axis=0)                                                     # (4, HW)
    return jnp.broadcast_to(m[:, None, :], (4, c_max, H * W))


def _fold_stage_weight(w_hwio, scale):
    """(3,3,Cin,Cout) HWIO conv weight + BN scale -> (9, Cout, Cin) folded taps."""
    cin, cout = w_hwio.shape[2], w_hwio.shape[3]
    w = jnp.transpose(w_hwio, (0, 1, 3, 2)).reshape(9, cout, cin)  # (ky*3+kx, Cout, Cin)
    return (w * scale[None, :, None]).astype(jnp.float32)


def basic_block3_forward(x_nchw, params):
    """Fused Pallas implementation of BasicBlock3.forward. x_nchw: (N, inplanes, H, W)."""
    N, C0, H, W = x_nchw.shape
    HW = H * W
    x_flat = x_nchw.reshape(N, C0, HW).astype(jnp.float32)

    (w1h, s1, b1), (w2h, s2, b2), (w3h, s3, b3), (w4h, s4, b4) = params
    w1 = _fold_stage_weight(w1h, s1)
    w2 = _fold_stage_weight(w2h, s2)
    w3 = _fold_stage_weight(w3h, s3)
    w4 = _fold_stage_weight(w4h, s4)
    b_all = jnp.concatenate([b1, b2, b3, b4]).astype(jnp.float32).reshape(-1, 1)
    c_total = b_all.shape[0]

    c_max = max(C0, w1.shape[1], w2.shape[1], w3.shape[1], w4.shape[1])
    masks = _make_edge_masks(H, W, c_max)

    kernel = functools.partial(_fractal_block_kernel, W)
    out_flat = pl.pallas_call(
        kernel,
        out_shape=jax.ShapeDtypeStruct((N, c_total, HW), jnp.float32),
        grid=(N,),
        in_specs=[
            pl.BlockSpec((1, C0, HW), lambda n: (n, 0, 0)),
            pl.BlockSpec(masks.shape, lambda n: (0, 0, 0)),
            pl.BlockSpec(w1.shape, lambda n: (0, 0, 0)),
            pl.BlockSpec(w2.shape, lambda n: (0, 0, 0)),
            pl.BlockSpec(w3.shape, lambda n: (0, 0, 0)),
            pl.BlockSpec(w4.shape, lambda n: (0, 0, 0)),
            pl.BlockSpec(b_all.shape, lambda n: (0, 0)),
        ],
        out_specs=pl.BlockSpec((1, c_total, HW), lambda n: (n, 0, 0)),
        compiler_params=pltpu.CompilerParams(dimension_semantics=("parallel",)),
    )(x_flat, masks, w1, w2, w3, w4, b_all)

    return out_flat.reshape(N, c_total, H, W)


def _make_stage_params(key, cin, cout, eps=1e-5):
    """Deterministic synthetic conv3x3 + BatchNorm2d(eval) parameters, BN folded."""
    k_w, k_b, k_g, k_be, k_m, k_v = jax.random.split(key, 6)
    w = 0.1 * jax.random.normal(k_w, (3, 3, cin, cout), jnp.float32)      # HWIO
    conv_b = 0.1 * jax.random.normal(k_b, (cout,), jnp.float32)
    gamma = 1.0 + 0.1 * jax.random.normal(k_g, (cout,), jnp.float32)
    beta = 0.1 * jax.random.normal(k_be, (cout,), jnp.float32)
    r_mean = 0.1 * jax.random.normal(k_m, (cout,), jnp.float32)
    r_var = jnp.abs(jax.random.normal(k_v, (cout,), jnp.float32)) + 0.5
    scale = gamma / jnp.sqrt(r_var + eps)
    bias = beta + scale * (conv_b - r_mean)
    return w, scale, bias


def _ref_conv_bn_relu(x_nhwc, w_hwio, scale, bias):
    y = jax.lax.conv_general_dilated(
        x_nhwc, w_hwio, window_strides=(1, 1), padding="SAME",
        dimension_numbers=("NHWC", "HWIO", "NHWC"))
    return jnp.maximum(y * scale + bias, 0.0)


def _ref_forward(x_nchw, params):
    x = jnp.transpose(x_nchw, (0, 2, 3, 1)).astype(jnp.float32)
    (w1, s1, b1), (w2, s2, b2), (w3, s3, b3), (w4, s4, b4) = params
    d1 = _ref_conv_bn_relu(x, w1, s1, b1)
    d2 = jnp.concatenate([d1, _ref_conv_bn_relu(d1, w2, s2, b2)], axis=-1)
    d3 = jnp.concatenate([d2, _ref_conv_bn_relu(d2, w3, s3, b3)], axis=-1)
    d4 = jnp.concatenate([d3, _ref_conv_bn_relu(d3, w4, s4, b4)], axis=-1)
    return jnp.transpose(d4, (0, 3, 1, 2))


if __name__ == "__main__":
    # Small shapes consistent with the module: N=2, inplanes=8, H=W=16.
    N, inplanes, H, W = 2, 8, 16, 16
    dim1 = inplanes // 4
    dim2 = inplanes // 4
    dim3 = inplanes // 4
    dim4 = inplanes - dim1 - dim2 - dim3

    key = jax.random.PRNGKey(0)
    kx, k1, k2, k3, k4 = jax.random.split(key, 5)
    x = jax.random.normal(kx, (N, inplanes, H, W), jnp.float32)

    params = (
        _make_stage_params(k1, inplanes, dim1),
        _make_stage_params(k2, dim1, dim2),
        _make_stage_params(k3, dim1 + dim2, dim3),
        _make_stage_params(k4, dim1 + dim2 + dim3, dim4),
    )

    fwd = jax.jit(basic_block3_forward)
    out = jax.block_until_ready(fwd(x, params))

    ref = jax.block_until_ready(_ref_forward(x, params))
    assert out.shape == (N, inplanes, H, W), out.shape
    max_err = float(jnp.max(jnp.abs(out - ref)))
    assert max_err < 1e-4, f"mismatch vs reference: {max_err}"

    print("KERNEL_OK")
</pallas_src>

<mosaic_0001>
module attributes {stable_mosaic.version = 11 : i64} {
  func.func @_fractal_block_kernel(%arg0: i32, %arg1: memref<1x8x256xf32, #tpu.memory_space<vmem>>, %arg2: memref<4x8x256xf32, #tpu.memory_space<vmem>>, %arg3: memref<9x2x8xf32, #tpu.memory_space<vmem>>, %arg4: memref<9x2x2xf32, #tpu.memory_space<vmem>>, %arg5: memref<9x2x4xf32, #tpu.memory_space<vmem>>, %arg6: memref<9x2x6xf32, #tpu.memory_space<vmem>>, %arg7: memref<8x1xf32, #tpu.memory_space<vmem>>, %arg8: memref<1x8x256xf32, #tpu.memory_space<vmem>>) attributes {dimension_semantics = [#tpu.dimension_semantics<parallel>], iteration_bounds = array<i64: 2>, scalar_prefetch = 0 : i64, scratch_operands = 0 : i64, tpu.core_type = #tpu.core_type<tc>, window_params = [{transform_indices = @transform_0, window_bounds = array<i64: 1, 8, 256>}, {pipeline_mode = #tpu.pipeline_mode<synchronous>, transform_indices = @transform_1, window_bounds = array<i64: 4, 8, 256>}, {pipeline_mode = #tpu.pipeline_mode<synchronous>, transform_indices = @transform_2, window_bounds = array<i64: 9, 2, 8>}, {pipeline_mode = #tpu.pipeline_mode<synchronous>, transform_indices = @transform_3, window_bounds = array<i64: 9, 2, 2>}, {pipeline_mode = #tpu.pipeline_mode<synchronous>, transform_indices = @transform_4, window_bounds = array<i64: 9, 2, 4>}, {pipeline_mode = #tpu.pipeline_mode<synchronous>, transform_indices = @transform_5, window_bounds = array<i64: 9, 2, 6>}, {pipeline_mode = #tpu.pipeline_mode<synchronous>, transform_indices = @transform_6, window_bounds = array<i64: 8, 1>}, {transform_indices = @transform_7, window_bounds = array<i64: 1, 8, 256>}]} {
    %c0 = arith.constant 0 : index
    %c0_0 = arith.constant 0 : index
    %c0_1 = arith.constant 0 : index
    %0 = vector.load %arg2[%c0, %c0_0, %c0_1] : memref<4x8x256xf32, #tpu.memory_space<vmem>>, vector<1x8x256xf32>
    %1 = vector.shape_cast %0 : vector<1x8x256xf32> to vector<8x256xf32>
    %c1 = arith.constant 1 : index
    %c0_2 = arith.constant 0 : index
    %c0_3 = arith.constant 0 : index
    %2 = vector.load %arg2[%c1, %c0_2, %c0_3] : memref<4x8x256xf32, #tpu.memory_space<vmem>>, vector<1x8x256xf32>
    %3 = vector.shape_cast %2 : vector<1x8x256xf32> to vector<8x256xf32>
    %c2 = arith.constant 2 : index
    %c0_4 = arith.constant 0 : index
    %c0_5 = arith.constant 0 : index
    %4 = vector.load %arg2[%c2, %c0_4, %c0_5] : memref<4x8x256xf32, #tpu.memory_space<vmem>>, vector<1x8x256xf32>
    %5 = vector.shape_cast %4 : vector<1x8x256xf32> to vector<8x256xf32>
    %c3 = arith.constant 3 : index
    %c0_6 = arith.constant 0 : index
    %c0_7 = arith.constant 0 : index
    %6 = vector.load %arg2[%c3, %c0_6, %c0_7] : memref<4x8x256xf32, #tpu.memory_space<vmem>>, vector<1x8x256xf32>
    %7 = vector.shape_cast %6 : vector<1x8x256xf32> to vector<8x256xf32>
    %c0_8 = arith.constant 0 : index
    %c0_9 = arith.constant 0 : index
    %c0_10 = arith.constant 0 : index
    %8 = vector.load %arg1[%c0_8, %c0_9, %c0_10] : memref<1x8x256xf32, #tpu.memory_space<vmem>>, vector<1x8x256xf32>
    %9 = vector.shape_cast %8 : vector<1x8x256xf32> to vector<8x256xf32>
    %c0_11 = arith.constant 0 : index
    %c0_12 = arith.constant 0 : index
    %10 = vector.load %arg7[%c0_11, %c0_12] : memref<8x1xf32, #tpu.memory_space<vmem>>, vector<2x1xf32>
    %c1_i32 = arith.constant 1 : i32
    %11 = tpu.dynamic_rotate %9 by %c1_i32 dim 1 : vector<8x256xf32>, i32 -> vector<8x256xf32>
    %12 = arith.mulf %11, %1 : vector<8x256xf32>
    %c255_i32 = arith.constant 255 : i32
    %13 = tpu.dynamic_rotate %9 by %c255_i32 dim 1 : vector<8x256xf32>, i32 -> vector<8x256xf32>
    %14 = arith.mulf %13, %3 : vector<8x256xf32>
    %c0_13 = arith.constant 0 : index
    %c0_14 = arith.constant 0 : index
    %c0_15 = arith.constant 0 : index
    %15 = vector.load %arg3[%c0_13, %c0_14, %c0_15] : memref<9x2x8xf32, #tpu.memory_space<vmem>>, vector<1x2x8xf32>
    %16 = vector.shape_cast %15 : vector<1x2x8xf32> to vector<2x8xf32>
    %cst = arith.constant dense<0.000000e+00> : vector<2x256xf32>
    %17 = tpu.matmul %16, %12, %cst {dimension_numbers = #tpu.dot_dimension_numbers<[1], [0], [0], [1], [0, 0, 1, 1], [], []>} : vector<2x8xf32>, vector<8x256xf32>, vector<2x256xf32> -> vector<2x256xf32>
    %c1_16 = arith.constant 1 : index
    %c0_17 = arith.constant 0 : index
    %c0_18 = arith.constant 0 : index
    %18 = vector.load %arg3[%c1_16, %c0_17, %c0_18] : memref<9x2x8xf32, #tpu.memory_space<vmem>>, vector<1x2x8xf32>
    %19 = vector.shape_cast %18 : vector<1x2x8xf32> to vector<2x8xf32>
    %cst_19 = arith.constant dense<0.000000e+00> : vector<2x256xf32>
    %20 = tpu.matmul %19, %9, %cst_19 {dimension_numbers = #tpu.dot_dimension_numbers<[1], [0], [0], [1], [0, 0, 1, 1], [], []>} : vector<2x8xf32>, vector<8x256xf32>, vector<2x256xf32> -> vector<2x256xf32>
    %21 = arith.addf %17, %20 : vector<2x256xf32>
    %c2_20 = arith.constant 2 : index
    %c0_21 = arith.constant 0 : index
    %c0_22 = arith.constant 0 : index
    %22 = vector.load %arg3[%c2_20, %c0_21, %c0_22] : memref<9x2x8xf32, #tpu.memory_space<vmem>>, vector<1x2x8xf32>
    %23 = vector.shape_cast %22 : vector<1x2x8xf32> to vector<2x8xf32>
    %cst_23 = arith.constant dense<0.000000e+00> : vector<2x256xf32>
    %24 = tpu.matmul %23, %14, %cst_23 {dimension_numbers = #tpu.dot_dimension_numbers<[1], [0], [0], [1], [0, 0, 1, 1], [], []>} : vector<2x8xf32>, vector<8x256xf32>, vector<2x256xf32> -> vector<2x256xf32>
    %25 = arith.addf %21, %24 : vector<2x256xf32>
    %c16_i32 = arith.constant 16 : i32
    %26 = tpu.dynamic_rotate %25 by %c16_i32 dim 1 : vector<2x256xf32>, i32 -> vector<2x256xf32>
    %27 = vector.extract_strided_slice %5 {offsets = [0, 0], sizes = [2, 256], strides = [1, 1]} : vector<8x256xf32> to vector<2x256xf32>
    %28 = arith.mulf %26, %27 : vector<2x256xf32>
    %c3_24 = arith.constant 3 : index
    %c0_25 = arith.constant 0 : index
    %c0_26 = arith.constant 0 : index
    %29 = vector.load %arg3[%c3_24, %c0_25, %c0_26] : memref<9x2x8xf32, #tpu.memory_space<vmem>>, vector<1x2x8xf32>
    %30 = vector.shape_cast %29 : vector<1x2x8xf32> to vector<2x8xf32>
    %cst_27 = arith.constant dense<0.000000e+00> : vector<2x256xf32>
    %31 = tpu.matmul %30, %12, %cst_27 {dimension_numbers = #tpu.dot_dimension_numbers<[1], [0], [0], [1], [0, 0, 1, 1], [], []>} : vector<2x8xf32>, vector<8x256xf32>, vector<2x256xf32> -> vector<2x256xf32>
    %c4 = arith.constant 4 : index
    %c0_28 = arith.constant 0 : index
    %c0_29 = arith.constant 0 : index
    %32 = vector.load %arg3[%c4, %c0_28, %c0_29] : memref<9x2x8xf32, #tpu.memory_space<vmem>>, vector<1x2x8xf32>
    %33 = vector.shape_cast %32 : vector<1x2x8xf32> to vector<2x8xf32>
    %cst_30 = arith.constant dense<0.000000e+00> : vector<2x256xf32>
    %34 = tpu.matmul %33, %9, %cst_30 {dimension_numbers = #tpu.dot_dimension_numbers<[1], [0], [0], [1], [0, 0, 1, 1], [], []>} : vector<2x8xf32>, vector<8x256xf32>, vector<2x256xf32> -> vector<2x256xf32>
    %35 = arith.addf %31, %34 : vector<2x256xf32>
    %c5 = arith.constant 5 : index
    %c0_31 = arith.constant 0 : index
    %c0_32 = arith.constant 0 : index
    %36 = vector.load %arg3[%c5, %c0_31, %c0_32] : memref<9x2x8xf32, #tpu.memory_space<vmem>>, vector<1x2x8xf32>
    %37 = vector.shape_cast %36 : vector<1x2x8xf32> to vector<2x8xf32>
    %cst_33 = arith.constant dense<0.000000e+00> : vector<2x256xf32>
    %38 = tpu.matmul %37, %14, %cst_33 {dimension_numbers = #tpu.dot_dimension_numbers<[1], [0], [0], [1], [0, 0, 1, 1], [], []>} : vector<2x8xf32>, vector<8x256xf32>, vector<2x256xf32> -> vector<2x256xf32>
    %39 = arith.addf %35, %38 : vector<2x256xf32>
    %40 = arith.addf %28, %39 : vector<2x256xf32>
    %c6 = arith.constant 6 : index
    %c0_34 = arith.constant 0 : index
    %c0_35 = arith.constant 0 : index
    %41 = vector.load %arg3[%c6, %c0_34, %c0_35] : memref<9x2x8xf32, #tpu.memory_space<vmem>>, vector<1x2x8xf32>
    %42 = vector.shape_cast %41 : vector<1x2x8xf32> to vector<2x8xf32>
    %cst_36 = arith.constant dense<0.000000e+00> : vector<2x256xf32>
    %43 = tpu.matmul %42, %12, %cst_36 {dimension_numbers = #tpu.dot_dimension_numbers<[1], [0], [0], [1], [0, 0, 1, 1], [], []>} : vector<2x8xf32>, vector<8x256xf32>, vector<2x256xf32> -> vector<2x256xf32>
    %c7 = arith.constant 7 : index
    %c0_37 = arith.constant 0 : index
    %c0_38 = arith.constant 0 : index
    %44 = vector.load %arg3[%c7, %c0_37, %c0_38] : memref<9x2x8xf32, #tpu.memory_space<vmem>>, vector<1x2x8xf32>
    %45 = vector.shape_cast %44 : vector<1x2x8xf32> to vector<2x8xf32>
    %cst_39 = arith.constant dense<0.000000e+00> : vector<2x256xf32>
    %46 = tpu.matmul %45, %9, %cst_39 {dimension_numbers = #tpu.dot_dimension_numbers<[1], [0], [0], [1], [0, 0, 1, 1], [], []>} : vector<2x8xf32>, vector<8x256xf32>, vector<2x256xf32> -> vector<2x256xf32>
    %47 = arith.addf %43, %46 : vector<2x256xf32>
    %c8 = arith.constant 8 : index
    %c0_40 = arith.constant 0 : index
    %c0_41 = arith.constant 0 : index
    %48 = vector.load %arg3[%c8, %c0_40, %c0_41] : memref<9x2x8xf32, #tpu.memory_space<vmem>>, vector<1x2x8xf32>
    %49 = vector.shape_cast %48 : vector<1x2x8xf32> to vector<2x8xf32>
    %cst_42 = arith.constant dense<0.000000e+00> : vector<2x256xf32>
    %50 = tpu.matmul %49, %14, %cst_42 {dimension_numbers = #tpu.dot_dimension_numbers<[1], [0], [0], [1], [0, 0, 1, 1], [], []>} : vector<2x8xf32>, vector<8x256xf32>, vector<2x256xf32> -> vector<2x256xf32>
    %51 = arith.addf %47, %50 : vector<2x256xf32>
    %c240_i32 = arith.constant 240 : i32
    %52 = tpu.dynamic_rotate %51 by %c240_i32 dim 1 : vector<2x256xf32>, i32 -> vector<2x256xf32>
    %53 = vector.extract_strided_slice %7 {offsets = [0, 0], sizes = [2, 256], strides = [1, 1]} : vector<8x256xf32> to vector<2x256xf32>
    %54 = arith.mulf %52, %53 : vector<2x256xf32>
    %55 = arith.addf %40, %54 : vector<2x256xf32>
    %56 = vector.broadcast %10 : vector<2x1xf32> to vector<2x256xf32>
    %57 = arith.addf %55, %56 : vector<2x256xf32>
    %cst_43 = arith.constant 0.000000e+00 : f32
    %58 = vector.broadcast %cst_43 : f32 to vector<2x256xf32>
    %59 = arith.maximumf %57, %58 : vector<2x256xf32>
    %c0_44 = arith.constant 0 : index
    %c0_45 = arith.constant 0 : index
    %c0_46 = arith.constant 0 : index
    %60 = vector.load %arg8[%c0_44, %c0_45, %c0_46] : memref<1x8x256xf32, #tpu.memory_space<vmem>>, vector<1x2x256xf32>
    %61 = vector.shape_cast %60 : vector<1x2x256xf32> to vector<2x256xf32>
    %62 = vector.shape_cast %59 : vector<2x256xf32> to vector<1x2x256xf32>
    tpu.vector_store %arg8[%c0_44, %c0_45, %c0_46], %62 {strides = array<i32>} : memref<1x8x256xf32, #tpu.memory_space<vmem>>, vector<1x2x256xf32>,
    %c2_47 = arith.constant 2 : index
    %c0_48 = arith.constant 0 : index
    %63 = vector.load %arg7[%c2_47, %c0_48] : memref<8x1xf32, #tpu.memory_space<vmem>>, vector<2x1xf32>
    %c1_i32_49 = arith.constant 1 : i32
    %64 = tpu.dynamic_rotate %59 by %c1_i32_49 dim 1 : vector<2x256xf32>, i32 -> vector<2x256xf32>
    %65 = vector.extract_strided_slice %1 {offsets = [0, 0], sizes = [2, 256], strides = [1, 1]} : vector<8x256xf32> to vector<2x256xf32>
    %66 = arith.mulf %64, %65 : vector<2x256xf32>
    %c255_i32_50 = arith.constant 255 : i32
    %67 = tpu.dynamic_rotate %59 by %c255_i32_50 dim 1 : vector<2x256xf32>, i32 -> vector<2x256xf32>
    %68 = vector.extract_strided_slice %3 {offsets = [0, 0], sizes = [2, 256], strides = [1, 1]} : vector<8x256xf32> to vector<2x256xf32>
    %69 = arith.mulf %67, %68 : vector<2x256xf32>
    %c0_51 = arith.constant 0 : index
    %c0_52 = arith.constant 0 : index
    %c0_53 = arith.constant 0 : index
    %70 = vector.load %arg4[%c0_51, %c0_52, %c0_53] : memref<9x2x2xf32, #tpu.memory_space<vmem>>, vector<1x2x2xf32>
    %71 = vector.shape_cast %70 : vector<1x2x2xf32> to vector<2x2xf32>
    %cst_54 = arith.constant dense<0.000000e+00> : vector<2x256xf32>
    %72 = tpu.matmul %71, %66, %cst_54 {dimension_numbers = #tpu.dot_dimension_numbers<[1], [0], [0], [1], [0, 0, 1, 1], [], []>} : vector<2x2xf32>, vector<2x256xf32>, vector<2x256xf32> -> vector<2x256xf32>
    %c1_55 = arith.constant 1 : index
    %c0_56 = arith.constant 0 : index
    %c0_57 = arith.constant 0 : index
    %73 = vector.load %arg4[%c1_55, %c0_56, %c0_57] : memref<9x2x2xf32, #tpu.memory_space<vmem>>, vector<1x2x2xf32>
    %74 = vector.shape_cast %73 : vector<1x2x2xf32> to vector<2x2xf32>
    %cst_58 = arith.constant dense<0.000000e+00> : vector<2x256xf32>
    %75 = tpu.matmul %74, %59, %cst_58 {dimension_numbers = #tpu.dot_dimension_numbers<[1], [0], [0], [1], [0, 0, 1, 1], [], []>} : vector<2x2xf32>, vector<2x256xf32>, vector<2x256xf32> -> vector<2x256xf32>
    %76 = arith.addf %72, %75 : vector<2x256xf32>
    %c2_59 = arith.constant 2 : index
    %c0_60 = arith.constant 0 : index
    %c0_61 = arith.constant 0 : index
    %77 = vector.load %arg4[%c2_59, %c0_60, %c0_61] : memref<9x2x2xf32, #tpu.memory_space<vmem>>, vector<1x2x2xf32>
    %78 = vector.shape_cast %77 : vector<1x2x2xf32> to vector<2x2xf32>
    %cst_62 = arith.constant dense<0.000000e+00> : vector<2x256xf32>
    %79 = tpu.matmul %78, %69, %cst_62 {dimension_numbers = #tpu.dot_dimension_numbers<[1], [0], [0], [1], [0, 0, 1, 1], [], []>} : vector<2x2xf32>, vector<2x256xf32>, vector<2x256xf32> -> vector<2x256xf32>
    %80 = arith.addf %76, %79 : vector<2x256xf32>
    %c16_i32_63 = arith.constant 16 : i32
    %81 = tpu.dynamic_rotate %80 by %c16_i32_63 dim 1 : vector<2x256xf32>, i32 -> vector<2x256xf32>
    %82 = vector.extract_strided_slice %5 {offsets = [0, 0], sizes = [2, 256], strides = [1, 1]} : vector<8x256xf32> to vector<2x256xf32>
    %83 = arith.mulf %81, %82 : vector<2x256xf32>
    %c3_64 = arith.constant 3 : index
    %c0_65 = arith.constant 0 : index
    %c0_66 = arith.constant 0 : index
    %84 = vector.load %arg4[%c3_64, %c0_65, %c0_66] : memref<9x2x2xf32, #tpu.memory_space<vmem>>, vector<1x2x2xf32>
    %85 = vector.shape_cast %84 : vector<1x2x2xf32> to vector<2x2xf32>
    %cst_67 = arith.constant dense<0.000000e+00> : vector<2x256xf32>
    %86 = tpu.matmul %85, %66, %cst_67 {dimension_numbers = #tpu.dot_dimension_numbers<[1], [0], [0], [1], [0, 0, 1, 1], [], []>} : vector<2x2xf32>, vector<2x256xf32>, vector<2x256xf32> -> vector<2x256xf32>
    %c4_68 = arith.constant 4 : index
    %c0_69 = arith.constant 0 : index
    %c0_70 = arith.constant 0 : index
    %87 = vector.load %arg4[%c4_68, %c0_69, %c0_70] : memref<9x2x2xf32, #tpu.memory_space<vmem>>, vector<1x2x2xf32>
    %88 = vector.shape_cast %87 : vector<1x2x2xf32> to vector<2x2xf32>
    %cst_71 = arith.constant dense<0.000000e+00> : vector<2x256xf32>
    %89 = tpu.matmul %88, %59, %cst_71 {dimension_numbers = #tpu.dot_dimension_numbers<[1], [0], [0], [1], [0, 0, 1, 1], [], []>} : vector<2x2xf32>, vector<2x256xf32>, vector<2x256xf32> -> vector<2x256xf32>
    %90 = arith.addf %86, %89 : vector<2x256xf32>
    %c5_72 = arith.constant 5 : index
    %c0_73 = arith.constant 0 : index
    %c0_74 = arith.constant 0 : index
    %91 = vector.load %arg4[%c5_72, %c0_73, %c0_74] : memref<9x2x2xf32, #tpu.memory_space<vmem>>, vector<1x2x2xf32>
    %92 = vector.shape_cast %91 : vector<1x2x2xf32> to vector<2x2xf32>
    %cst_75 = arith.constant dense<0.000000e+00> : vector<2x256xf32>
    %93 = tpu.matmul %92, %69, %cst_75 {dimension_numbers = #tpu.dot_dimension_numbers<[1], [0], [0], [1], [0, 0, 1, 1], [], []>} : vector<2x2xf32>, vector<2x256xf32>, vector<2x256xf32> -> vector<2x256xf32>
    %94 = arith.addf %90, %93 : vector<2x256xf32>
    %95 = arith.addf %83, %94 : vector<2x256xf32>
    %c6_76 = arith.constant 6 : index
    %c0_77 = arith.constant 0 : index
    %c0_78 = arith.constant 0 : index
    %96 = vector.load %arg4[%c6_76, %c0_77, %c0_78] : memref<9x2x2xf32, #tpu.memory_space<vmem>>, vector<1x2x2xf32>
    %97 = vector.shape_cast %96 : vector<1x2x2xf32> to vector<2x2xf32>
    %cst_79 = arith.constant dense<0.000000e+00> : vector<2x256xf32>
    %98 = tpu.matmul %97, %66, %cst_79 {dimension_numbers = #tpu.dot_dimension_numbers<[1], [0], [0], [1], [0, 0, 1, 1], [], []>} : vector<2x2xf32>, vector<2x256xf32>, vector<2x256xf32> -> vector<2x256xf32>
    %c7_80 = arith.constant 7 : index
    %c0_81 = arith.constant 0 : index
    %c0_82 = arith.constant 0 : index
    %99 = vector.load %arg4[%c7_80, %c0_81, %c0_82] : memref<9x2x2xf32, #tpu.memory_space<vmem>>, vector<1x2x2xf32>
    %100 = vector.shape_cast %99 : vector<1x2x2xf32> to vector<2x2xf32>
    %cst_83 = arith.constant dense<0.000000e+00> : vector<2x256xf32>
    %101 = tpu.matmul %100, %59, %cst_83 {dimension_numbers = #tpu.dot_dimension_numbers<[1], [0], [0], [1], [0, 0, 1, 1], [], []>} : vector<2x2xf32>, vector<2x256xf32>, vector<2x256xf32> -> vector<2x256xf32>
    %102 = arith.addf %98, %101 : vector<2x256xf32>
    %c8_84 = arith.constant 8 : index
    %c0_85 = arith.constant 0 : index
    %c0_86 = arith.constant 0 : index
    %103 = vector.load %arg4[%c8_84, %c0_85, %c0_86] : memref<9x2x2xf32, #tpu.memory_space<vmem>>, vector<1x2x2xf32>
    %104 = vector.shape_cast %103 : vector<1x2x2xf32> to vector<2x2xf32>
    %cst_87 = arith.constant dense<0.000000e+00> : vector<2x256xf32>
    %105 = tpu.matmul %104, %69, %cst_87 {dimension_numbers = #tpu.dot_dimension_numbers<[1], [0], [0], [1], [0, 0, 1, 1], [], []>} : vector<2x2xf32>, vector<2x256xf32>, vector<2x256xf32> -> vector<2x256xf32>
    %106 = arith.addf %102, %105 : vector<2x256xf32>
    %c240_i32_88 = arith.constant 240 : i32
    %107 = tpu.dynamic_rotate %106 by %c240_i32_88 dim 1 : vector<2x256xf32>, i32 -> vector<2x256xf32>
    %108 = vector.extract_strided_slice %7 {offsets = [0, 0], sizes = [2, 256], strides = [1, 1]} : vector<8x256xf32> to vector<2x256xf32>
    %109 = arith.mulf %107, %108 : vector<2x256xf32>
    %110 = arith.addf %95, %109 : vector<2x256xf32>
    %111 = vector.broadcast %63 : vector<2x1xf32> to vector<2x256xf32>
    %112 = arith.addf %110, %111 : vector<2x256xf32>
    %cst_89 = arith.constant 0.000000e+00 : f32
    %113 = vector.broadcast %cst_89 : f32 to vector<2x256xf32>
    %114 = arith.maximumf %112, %113 : vector<2x256xf32>
    %c0_90 = arith.constant 0 : index
    %c2_91 = arith.constant 2 : index
    %c0_92 = arith.constant 0 : index
    %115 = vector.load %arg8[%c0_90, %c2_91, %c0_92] : memref<1x8x256xf32, #tpu.memory_space<vmem>>, vector<1x2x256xf32>
    %116 = vector.shape_cast %115 : vector<1x2x256xf32> to vector<2x256xf32>
    %117 = vector.shape_cast %114 : vector<2x256xf32> to vector<1x2x256xf32>
    tpu.vector_store %arg8[%c0_90, %c2_91, %c0_92], %117 {strides = array<i32>} : memref<1x8x256xf32, #tpu.memory_space<vmem>>, vector<1x2x256xf32>,
    %c0_93 = arith.constant 0 : index
    %c0_94 = arith.constant 0 : index
    %c0_95 = arith.constant 0 : index
    %118 = vector.load %arg8[%c0_93, %c0_94, %c0_95] : memref<1x8x256xf32, #tpu.memory_space<vmem>>, vector<1x4x256xf32>
    %119 = vector.shape_cast %118 : vector<1x4x256xf32> to vector<4x256xf32>
    %c4_96 = arith.constant 4 : index
    %c0_97 = arith.constant 0 : index
    %120 = vector.load %arg7[%c4_96, %c0_97] : memref<8x1xf32, #tpu.memory_space<vmem>>, vector<2x1xf32>
    %c1_i32_98 = arith.constant 1 : i32
    %121 = tpu.dynamic_rotate %119 by %c1_i32_98 dim 1 : vector<4x256xf32>, i32 -> vector<4x256xf32>
    %122 = vector.extract_strided_slice %1 {offsets = [0, 0], sizes = [4, 256], strides = [1, 1]} : vector<8x256xf32> to vector<4x256xf32>
    %123 = arith.mulf %121, %122 : vector<4x256xf32>
    %c255_i32_99 = arith.constant 255 : i32
    %124 = tpu.dynamic_rotate %119 by %c255_i32_99 dim 1 : vector<4x256xf32>, i32 -> vector<4x256xf32>
    %125 = vector.extract_strided_slice %3 {offsets = [0, 0], sizes = [4, 256], strides = [1, 1]} : vector<8x256xf32> to vector<4x256xf32>
    %126 = arith.mulf %124, %125 : vector<4x256xf32>
    %c0_100 = arith.constant 0 : index
    %c0_101 = arith.constant 0 : index
    %c0_102 = arith.constant 0 : index
    %127 = vector.load %arg5[%c0_100, %c0_101, %c0_102] : memref<9x2x4xf32, #tpu.memory_space<vmem>>, vector<1x2x4xf32>
    %128 = vector.shape_cast %127 : vector<1x2x4xf32> to vector<2x4xf32>
    %cst_103 = arith.constant dense<0.000000e+00> : vector<2x256xf32>
    %129 = tpu.matmul %128, %123, %cst_103 {dimension_numbers = #tpu.dot_dimension_numbers<[1], [0], [0], [1], [0, 0, 1, 1], [], []>} : vector<2x4xf32>, vector<4x256xf32>, vector<2x256xf32> -> vector<2x256xf32>
    %c1_104 = arith.constant 1 : index
    %c0_105 = arith.constant 0 : index
    %c0_106 = arith.constant 0 : index
    %130 = vector.load %arg5[%c1_104, %c0_105, %c0_106] : memref<9x2x4xf32, #tpu.memory_space<vmem>>, vector<1x2x4xf32>
    %131 = vector.shape_cast %130 : vector<1x2x4xf32> to vector<2x4xf32>
    %cst_107 = arith.constant dense<0.000000e+00> : vector<2x256xf32>
    %132 = tpu.matmul %131, %119, %cst_107 {dimension_numbers = #tpu.dot_dimension_numbers<[1], [0], [0], [1], [0, 0, 1, 1], [], []>} : vector<2x4xf32>, vector<4x256xf32>, vector<2x256xf32> -> vector<2x256xf32>
    %133 = arith.addf %129, %132 : vector<2x256xf32>
    %c2_108 = arith.constant 2 : index
    %c0_109 = arith.constant 0 : index
    %c0_110 = arith.constant 0 : index
    %134 = vector.load %arg5[%c2_108, %c0_109, %c0_110] : memref<9x2x4xf32, #tpu.memory_space<vmem>>, vector<1x2x4xf32>
    %135 = vector.shape_cast %134 : vector<1x2x4xf32> to vector<2x4xf32>
    %cst_111 = arith.constant dense<0.000000e+00> : vector<2x256xf32>
    %136 = tpu.matmul %135, %126, %cst_111 {dimension_numbers = #tpu.dot_dimension_numbers<[1], [0], [0], [1], [0, 0, 1, 1], [], []>} : vector<2x4xf32>, vector<4x256xf32>, vector<2x256xf32> -> vector<2x256xf32>
    %137 = arith.addf %133, %136 : vector<2x256xf32>
    %c16_i32_112 = arith.constant 16 : i32
    %138 = tpu.dynamic_rotate %137 by %c16_i32_112 dim 1 : vector<2x256xf32>, i32 -> vector<2x256xf32>
    %139 = vector.extract_strided_slice %5 {offsets = [0, 0], sizes = [2, 256], strides = [1, 1]} : vector<8x256xf32> to vector<2x256xf32>
    %140 = arith.mulf %138, %139 : vector<2x256xf32>
    %c3_113 = arith.constant 3 : index
    %c0_114 = arith.constant 0 : index
    %c0_115 = arith.constant 0 : index
    %141 = vector.load %arg5[%c3_113, %c0_114, %c0_115] : memref<9x2x4xf32, #tpu.memory_space<vmem>>, vector<1x2x4xf32>
    %142 = vector.shape_cast %141 : vector<1x2x4xf32> to vector<2x4xf32>
    %cst_116 = arith.constant dense<0.000000e+00> : vector<2x256xf32>
    %143 = tpu.matmul %142, %123, %cst_116 {dimension_numbers = #tpu.dot_dimension_numbers<[1], [0], [0], [1], [0, 0, 1, 1], [], []>} : vector<2x4xf32>, vector<4x256xf32>, vector<2x256xf32> -> vector<2x256xf32>
    %c4_117 = arith.constant 4 : index
    %c0_118 = arith.constant 0 : index
    %c0_119 = arith.constant 0 : index
    %144 = vector.load %arg5[%c4_117, %c0_118, %c0_119] : memref<9x2x4xf32, #tpu.memory_space<vmem>>, vector<1x2x4xf32>
    %145 = vector.shape_cast %144 : vector<1x2x4xf32> to vector<2x4xf32>
    %cst_120 = arith.constant dense<0.000000e+00> : vector<2x256xf32>
    %146 = tpu.matmul %145, %119, %cst_120 {dimension_numbers = #tpu.dot_dimension_numbers<[1], [0], [0], [1], [0, 0, 1, 1], [], []>} : vector<2x4xf32>, vector<4x256xf32>, vector<2x256xf32> -> vector<2x256xf32>
    %147 = arith.addf %143, %146 : vector<2x256xf32>
    %c5_121 = arith.constant 5 : index
    %c0_122 = arith.constant 0 : index
    %c0_123 = arith.constant 0 : index
    %148 = vector.load %arg5[%c5_121, %c0_122, %c0_123] : memref<9x2x4xf32, #tpu.memory_space<vmem>>, vector<1x2x4xf32>
    %149 = vector.shape_cast %148 : vector<1x2x4xf32> to vector<2x4xf32>
    %cst_124 = arith.constant dense<0.000000e+00> : vector<2x256xf32>
    %150 = tpu.matmul %149, %126, %cst_124 {dimension_numbers = #tpu.dot_dimension_numbers<[1], [0], [0], [1], [0, 0, 1, 1], [], []>} : vector<2x4xf32>, vector<4x256xf32>, vector<2x256xf32> -> vector<2x256xf32>
    %151 = arith.addf %147, %150 : vector<2x256xf32>
    %152 = arith.addf %140, %151 : vector<2x256xf32>
    %c6_125 = arith.constant 6 : index
    %c0_126 = arith.constant 0 : index
    %c0_127 = arith.constant 0 : index
    %153 = vector.load %arg5[%c6_125, %c0_126, %c0_127] : memref<9x2x4xf32, #tpu.memory_space<vmem>>, vector<1x2x4xf32>
    %154 = vector.shape_cast %153 : vector<1x2x4xf32> to vector<2x4xf32>
    %cst_128 = arith.constant dense<0.000000e+00> : vector<2x256xf32>
    %155 = tpu.matmul %154, %123, %cst_128 {dimension_numbers = #tpu.dot_dimension_numbers<[1], [0], [0], [1], [0, 0, 1, 1], [], []>} : vector<2x4xf32>, vector<4x256xf32>, vector<2x256xf32> -> vector<2x256xf32>
    %c7_129 = arith.constant 7 : index
    %c0_130 = arith.constant 0 : index
    %c0_131 = arith.constant 0 : index
    %156 = vector.load %arg5[%c7_129, %c0_130, %c0_131] : memref<9x2x4xf32, #tpu.memory_space<vmem>>, vector<1x2x4xf32>
    %157 = vector.shape_cast %156 : vector<1x2x4xf32> to vector<2x4xf32>
    %cst_132 = arith.constant dense<0.000000e+00> : vector<2x256xf32>
    %158 = tpu.matmul %157, %119, %cst_132 {dimension_numbers = #tpu.dot_dimension_numbers<[1], [0], [0], [1], [0, 0, 1, 1], [], []>} : vector<2x4xf32>, vector<4x256xf32>, vector<2x256xf32> -> vector<2x256xf32>
    %159 = arith.addf %155, %158 : vector<2x256xf32>
    %c8_133 = arith.constant 8 : index
    %c0_134 = arith.constant 0 : index
    %c0_135 = arith.constant 0 : index
    %160 = vector.load %arg5[%c8_133, %c0_134, %c0_135] : memref<9x2x4xf32, #tpu.memory_space<vmem>>, vector<1x2x4xf32>
    %161 = vector.shape_cast %160 : vector<1x2x4xf32> to vector<2x4xf32>
    %cst_136 = arith.constant dense<0.000000e+00> : vector<2x256xf32>
    %162 = tpu.matmul %161, %126, %cst_136 {dimension_numbers = #tpu.dot_dimension_numbers<[1], [0], [0], [1], [0, 0, 1, 1], [], []>} : vector<2x4xf32>, vector<4x256xf32>, vector<2x256xf32> -> vector<2x256xf32>
    %163 = arith.addf %159, %162 : vector<2x256xf32>
    %c240_i32_137 = arith.constant 240 : i32
    %164 = tpu.dynamic_rotate %163 by %c240_i32_137 dim 1 : vector<2x256xf32>, i32 -> vector<2x256xf32>
    %165 = vector.extract_strided_slice %7 {offsets = [0, 0], sizes = [2, 256], strides = [1, 1]} : vector<8x256xf32> to vector<2x256xf32>
    %166 = arith.mulf %164, %165 : vector<2x256xf32>
    %167 = arith.addf %152, %166 : vector<2x256xf32>
    %168 = vector.broadcast %120 : vector<2x1xf32> to vector<2x256xf32>
    %169 = arith.addf %167, %168 : vector<2x256xf32>
    %cst_138 = arith.constant 0.000000e+00 : f32
    %170 = vector.broadcast %cst_138 : f32 to vector<2x256xf32>
    %171 = arith.maximumf %169, %170 : vector<2x256xf32>
    %c0_139 = arith.constant 0 : index
    %c4_140 = arith.constant 4 : index
    %c0_141 = arith.constant 0 : index
    %172 = vector.load %arg8[%c0_139, %c4_140, %c0_141] : memref<1x8x256xf32, #tpu.memory_space<vmem>>, vector<1x2x256xf32>
    %173 = vector.shape_cast %172 : vector<1x2x256xf32> to vector<2x256xf32>
    %174 = vector.shape_cast %171 : vector<2x256xf32> to vector<1x2x256xf32>
    tpu.vector_store %arg8[%c0_139, %c4_140, %c0_141], %174 {strides = array<i32>} : memref<1x8x256xf32, #tpu.memory_space<vmem>>, vector<1x2x256xf32>,
    %c0_142 = arith.constant 0 : index
    %c0_143 = arith.constant 0 : index
    %c0_144 = arith.constant 0 : index
    %175 = vector.load %arg8[%c0_142, %c0_143, %c0_144] : memref<1x8x256xf32, #tpu.memory_space<vmem>>, vector<1x6x256xf32>
    %176 = vector.shape_cast %175 : vector<1x6x256xf32> to vector<6x256xf32>
    %c6_145 = arith.constant 6 : index
    %c0_146 = arith.constant 0 : index
    %177 = vector.load %arg7[%c6_145, %c0_146] : memref<8x1xf32, #tpu.memory_space<vmem>>, vector<2x1xf32>
    %c1_i32_147 = arith.constant 1 : i32
    %178 = tpu.dynamic_rotate %176 by %c1_i32_147 dim 1 : vector<6x256xf32>, i32 -> vector<6x256xf32>
    %179 = vector.extract_strided_slice %1 {offsets = [0, 0], sizes = [6, 256], strides = [1, 1]} : vector<8x256xf32> to vector<6x256xf32>
    %180 = arith.mulf %178, %179 : vector<6x256xf32>
    %c255_i32_148 = arith.constant 255 : i32
    %181 = tpu.dynamic_rotate %176 by %c255_i32_148 dim 1 : vector<6x256xf32>, i32 -> vector<6x256xf32>
    %182 = vector.extract_strided_slice %3 {offsets = [0, 0], sizes = [6, 256], strides = [1, 1]} : vector<8x256xf32> to vector<6x256xf32>
    %183 = arith.mulf %181, %182 : vector<6x256xf32>
    %c0_149 = arith.constant 0 : index
    %c0_150 = arith.constant 0 : index
    %c0_151 = arith.constant 0 : index
    %184 = vector.load %arg6[%c0_149, %c0_150, %c0_151] : memref<9x2x6xf32, #tpu.memory_space<vmem>>, vector<1x2x6xf32>
    %185 = vector.shape_cast %184 : vector<1x2x6xf32> to vector<2x6xf32>
    %cst_152 = arith.constant dense<0.000000e+00> : vector<2x256xf32>
    %186 = tpu.matmul %185, %180, %cst_152 {dimension_numbers = #tpu.dot_dimension_numbers<[1], [0], [0], [1], [0, 0, 1, 1], [], []>} : vector<2x6xf32>, vector<6x256xf32>, vector<2x256xf32> -> vector<2x256xf32>
    %c1_153 = arith.constant 1 : index
    %c0_154 = arith.constant 0 : index
    %c0_155 = arith.constant 0 : index
    %187 = vector.load %arg6[%c1_153, %c0_154, %c0_155] : memref<9x2x6xf32, #tpu.memory_space<vmem>>, vector<1x2x6xf32>
    %188 = vector.shape_cast %187 : vector<1x2x6xf32> to vector<2x6xf32>
    %cst_156 = arith.constant dense<0.000000e+00> : vector<2x256xf32>
    %189 = tpu.matmul %188, %176, %cst_156 {dimension_numbers = #tpu.dot_dimension_numbers<[1], [0], [0], [1], [0, 0, 1, 1], [], []>} : vector<2x6xf32>, vector<6x256xf32>, vector<2x256xf32> -> vector<2x256xf32>
    %190 = arith.addf %186, %189 : vector<2x256xf32>
    %c2_157 = arith.constant 2 : index
    %c0_158 = arith.constant 0 : index
    %c0_159 = arith.constant 0 : index
    %191 = vector.load %arg6[%c2_157, %c0_158, %c0_159] : memref<9x2x6xf32, #tpu.memory_space<vmem>>, vector<1x2x6xf32>
    %192 = vector.shape_cast %191 : vector<1x2x6xf32> to vector<2x6xf32>
    %cst_160 = arith.constant dense<0.000000e+00> : vector<2x256xf32>
    %193 = tpu.matmul %192, %183, %cst_160 {dimension_numbers = #tpu.dot_dimension_numbers<[1], [0], [0], [1], [0, 0, 1, 1], [], []>} : vector<2x6xf32>, vector<6x256xf32>, vector<2x256xf32> -> vector<2x256xf32>
    %194 = arith.addf %190, %193 : vector<2x256xf32>
    %c16_i32_161 = arith.constant 16 : i32
    %195 = tpu.dynamic_rotate %194 by %c16_i32_161 dim 1 : vector<2x256xf32>, i32 -> vector<2x256xf32>
    %196 = vector.extract_strided_slice %5 {offsets = [0, 0], sizes = [2, 256], strides = [1, 1]} : vector<8x256xf32> to vector<2x256xf32>
    %197 = arith.mulf %195, %196 : vector<2x256xf32>
    %c3_162 = arith.constant 3 : index
    %c0_163 = arith.constant 0 : index
    %c0_164 = arith.constant 0 : index
    %198 = vector.load %arg6[%c3_162, %c0_163, %c0_164] : memref<9x2x6xf32, #tpu.memory_space<vmem>>, vector<1x2x6xf32>
    %199 = vector.shape_cast %198 : vector<1x2x6xf32> to vector<2x6xf32>
    %cst_165 = arith.constant dense<0.000000e+00> : vector<2x256xf32>
    %200 = tpu.matmul %199, %180, %cst_165 {dimension_numbers = #tpu.dot_dimension_numbers<[1], [0], [0], [1], [0, 0, 1, 1], [], []>} : vector<2x6xf32>, vector<6x256xf32>, vector<2x256xf32> -> vector<2x256xf32>
    %c4_166 = arith.constant 4 : index
    %c0_167 = arith.constant 0 : index
    %c0_168 = arith.constant 0 : index
    %201 = vector.load %arg6[%c4_166, %c0_167, %c0_168] : memref<9x2x6xf32, #tpu.memory_space<vmem>>, vector<1x2x6xf32>
    %202 = vector.shape_cast %201 : vector<1x2x6xf32> to vector<2x6xf32>
    %cst_169 = arith.constant dense<0.000000e+00> : vector<2x256xf32>
    %203 = tpu.matmul %202, %176, %cst_169 {dimension_numbers = #tpu.dot_dimension_numbers<[1], [0], [0], [1], [0, 0, 1, 1], [], []>} : vector<2x6xf32>, vector<6x256xf32>, vector<2x256xf32> -> vector<2x256xf32>
    %204 = arith.addf %200, %203 : vector<2x256xf32>
    %c5_170 = arith.constant 5 : index
    %c0_171 = arith.constant 0 : index
    %c0_172 = arith.constant 0 : index
    %205 = vector.load %arg6[%c5_170, %c0_171, %c0_172] : memref<9x2x6xf32, #tpu.memory_space<vmem>>, vector<1x2x6xf32>
    %206 = vector.shape_cast %205 : vector<1x2x6xf32> to vector<2x6xf32>
    %cst_173 = arith.constant dense<0.000000e+00> : vector<2x256xf32>
    %207 = tpu.matmul %206, %183, %cst_173 {dimension_numbers = #tpu.dot_dimension_numbers<[1], [0], [0], [1], [0, 0, 1, 1], [], []>} : vector<2x6xf32>, vector<6x256xf32>, vector<2x256xf32> -> vector<2x256xf32>
    %208 = arith.addf %204, %207 : vector<2x256xf32>
    %209 = arith.addf %197, %208 : vector<2x256xf32>
    %c6_174 = arith.constant 6 : index
    %c0_175 = arith.constant 0 : index
    %c0_176 = arith.constant 0 : index
    %210 = vector.load %arg6[%c6_174, %c0_175, %c0_176] : memref<9x2x6xf32, #tpu.memory_space<vmem>>, vector<1x2x6xf32>
    %211 = vector.shape_cast %210 : vector<1x2x6xf32> to vector<2x6xf32>
    %cst_177 = arith.constant dense<0.000000e+00> : vector<2x256xf32>
    %212 = tpu.matmul %211, %180, %cst_177 {dimension_numbers = #tpu.dot_dimension_numbers<[1], [0], [0], [1], [0, 0, 1, 1], [], []>} : vector<2x6xf32>, vector<6x256xf32>, vector<2x256xf32> -> vector<2x256xf32>
    %c7_178 = arith.constant 7 : index
    %c0_179 = arith.constant 0 : index
    %c0_180 = arith.constant 0 : index
    %213 = vector.load %arg6[%c7_178, %c0_179, %c0_180] : memref<9x2x6xf32, #tpu.memory_space<vmem>>, vector<1x2x6xf32>
    %214 = vector.shape_cast %213 : vector<1x2x6xf32> to vector<2x6xf32>
    %cst_181 = arith.constant dense<0.000000e+00> : vector<2x256xf32>
    %215 = tpu.matmul %214, %176, %cst_181 {dimension_numbers = #tpu.dot_dimension_numbers<[1], [0], [0], [1], [0, 0, 1, 1], [], []>} : vector<2x6xf32>, vector<6x256xf32>, vector<2x256xf32> -> vector<2x256xf32>
    %216 = arith.addf %212, %215 : vector<2x256xf32>
    %c8_182 = arith.constant 8 : index
    %c0_183 = arith.constant 0 : index
    %c0_184 = arith.constant 0 : index
    %217 = vector.load %arg6[%c8_182, %c0_183, %c0_184] : memref<9x2x6xf32, #tpu.memory_space<vmem>>, vector<1x2x6xf32>
    %218 = vector.shape_cast %217 : vector<1x2x6xf32> to vector<2x6xf32>
    %cst_185 = arith.constant dense<0.000000e+00> : vector<2x256xf32>
    %219 = tpu.matmul %218, %183, %cst_185 {dimension_numbers = #tpu.dot_dimension_numbers<[1], [0], [0], [1], [0, 0, 1, 1], [], []>} : vector<2x6xf32>, vector<6x256xf32>, vector<2x256xf32> -> vector<2x256xf32>
    %220 = arith.addf %216, %219 : vector<2x256xf32>
    %c240_i32_186 = arith.constant 240 : i32
    %221 = tpu.dynamic_rotate %220 by %c240_i32_186 dim 1 : vector<2x256xf32>, i32 -> vector<2x256xf32>
    %222 = vector.extract_strided_slice %7 {offsets = [0, 0], sizes = [2, 256], strides = [1, 1]} : vector<8x256xf32> to vector<2x256xf32>
    %223 = arith.mulf %221, %222 : vector<2x256xf32>
    %224 = arith.addf %209, %223 : vector<2x256xf32>
    %225 = vector.broadcast %177 : vector<2x1xf32> to vector<2x256xf32>
    %226 = arith.addf %224, %225 : vector<2x256xf32>
    %cst_187 = arith.constant 0.000000e+00 : f32
    %227 = vector.broadcast %cst_187 : f32 to vector<2x256xf32>
    %228 = arith.maximumf %226, %227 : vector<2x256xf32>
    %c0_188 = arith.constant 0 : index
    %c6_189 = arith.constant 6 : index
    %c0_190 = arith.constant 0 : index
    %229 = vector.load %arg8[%c0_188, %c6_189, %c0_190] : memref<1x8x256xf32, #tpu.memory_space<vmem>>, vector<1x2x256xf32>
    %230 = vector.shape_cast %229 : vector<1x2x256xf32> to vector<2x256xf32>
    %231 = vector.shape_cast %228 : vector<2x256xf32> to vector<1x2x256xf32>
    tpu.vector_store %arg8[%c0_188, %c6_189, %c0_190], %231 {strides = array<i32>} : memref<1x8x256xf32, #tpu.memory_space<vmem>>, vector<1x2x256xf32>,
    return
  }
  func.func @transform_0(%arg0: i32) -> (i32, i32, i32) {
    %c0_i32 = arith.constant 0 : i32
    %c0_i32_0 = arith.constant 0 : i32
    %c0_i32_1 = arith.constant 0 : i32
    return %arg0, %c0_i32, %c0_i32_0 : i32, i32, i32
  }
  func.func @transform_1(%arg0: i32) -> (i32, i32, i32) {
    %c0_i32 = arith.constant 0 : i32
    %c0_i32_0 = arith.constant 0 : i32
    %c0_i32_1 = arith.constant 0 : i32
    %c0_i32_2 = arith.constant 0 : i32
    return %c0_i32, %c0_i32_0, %c0_i32_1 : i32, i32, i32
  }
  func.func @transform_2(%arg0: i32) -> (i32, i32, i32) {
    %c0_i32 = arith.constant 0 : i32
    %c0_i32_0 = arith.constant 0 : i32
    %c0_i32_1 = arith.constant 0 : i32
    %c0_i32_2 = arith.constant 0 : i32
    return %c0_i32, %c0_i32_0, %c0_i32_1 : i32, i32, i32
  }
  func.func @transform_3(%arg0: i32) -> (i32, i32, i32) {
    %c0_i32 = arith.constant 0 : i32
    %c0_i32_0 = arith.constant 0 : i32
    %c0_i32_1 = arith.constant 0 : i32
    %c0_i32_2 = arith.constant 0 : i32
    return %c0_i32, %c0_i32_0, %c0_i32_1 : i32, i32, i32
  }
  func.func @transform_4(%arg0: i32) -> (i32, i32, i32) {
    %c0_i32 = arith.constant 0 : i32
    %c0_i32_0 = arith.constant 0 : i32
    %c0_i32_1 = arith.constant 0 : i32
    %c0_i32_2 = arith.constant 0 : i32
    return %c0_i32, %c0_i32_0, %c0_i32_1 : i32, i32, i32
  }
  func.func @transform_5(%arg0: i32) -> (i32, i32, i32) {
    %c0_i32 = arith.constant 0 : i32
    %c0_i32_0 = arith.constant 0 : i32
    %c0_i32_1 = arith.constant 0 : i32
    %c0_i32_2 = arith.constant 0 : i32
    return %c0_i32, %c0_i32_0, %c0_i32_1 : i32, i32, i32
  }
  func.func @transform_6(%arg0: i32) -> (i32, i32) {
    %c0_i32 = arith.constant 0 : i32
    %c0_i32_0 = arith.constant 0 : i32
    %c0_i32_1 = arith.constant 0 : i32
    return %c0_i32, %c0_i32_0 : i32, i32
  }
  func.func @transform_7(%arg0: i32) -> (i32, i32, i32) {
    %c0_i32 = arith.constant 0 : i32
    %c0_i32_0 = arith.constant 0 : i32
    %c0_i32_1 = arith.constant 0 : i32
    return %arg0, %c0_i32, %c0_i32_0 : i32, i32, i32
  }
}

</mosaic_0001>

<bundles_post_ra>
// kernel: basic_block3_forward.1
= control target key start
LH: loop header
LB: loop body
LE: loop exit
PB: predicated region body
PF: predicated region fallthrough
CT: control target
= control target key end

     0   :  { %s3643_s24 = smov 0   ;;  %s4101_s0 = inlined_call_operand.vmem [shape: f32[2,8,256], index: 0, kind: input, shape index: {}]   ;;  %s4102_s1 = inlined_call_operand.vmem [shape: f32[4,8,256], index: 1, kind: input, shape index: {}]   ;;  %s4103_s2 = inlined_call_operand.vmem [shape: f32[9,2,8], index: 2, kind: input, shape index: {}]   ;;  %s4104_s3 = inlined_call_operand.vmem [shape: f32[9,2,2], index: 3, kind: input, shape index: {}]   ;;  %s4105_s4 = inlined_call_operand.vmem [shape: f32[9,2,4], index: 4, kind: input, shape index: {}]   ;;  %s4106_s5 = inlined_call_operand.vmem [shape: f32[9,2,6], index: 5, kind: input, shape index: {}]   ;;  %s4107_s6 = inlined_call_operand.vmem [shape: f32[8,1], index: 6, kind: input, shape index: {}]   ;;  %s4108_s7 = inlined_call_operand.vmem [shape: f32[2,8,256], index: 7, kind: output, shape index: {}]  }
   0x1 LB: > { %s3384_s25 = sadd.s32 4294967295, %s3595_s24   ;;  %p3388_p0 = scmp.ge.s32.totalorder %s3595_s24, 1  ;;  %s3595_s24 = sphi %s3643_s24, %s17_s24  }
   0x2   : > { %p237_p1 = scmp.lt.s32.totalorder %s3595_s24, 3 }
   0x4   : > { %p238_p2 = pnand %p3388_p0, %p237_p1 }
   0x5   : > { %p269_p3 = scmp.lt.s32.totalorder (!%p238_p2), %s3384_s25, 1  ;;  %v3597_v0 = vmov (!%p238_p2), 0.0   ;;  %v3399_v2 = vld [vmem:[%s4103_s2 + $0x2] sm:$0x3] (!%p238_p2)  ;;  %s3598_s9 = smov (!%p238_p2), 1   ;;  %vm316_vm0 = vcmask (!%p238_p2), 64512   ;;  %v297_v5 = vlaneseq (!%p238_p2) }
   0x6   : > { %241 = sbr.rel (%p238_p2) target bundleno = 1990 (0x7c6), region = 48  ;;  %384 = vmatprep.mubr.f32.mxu0 (!%p238_p2), %v3597_v0  ;;  %623 = vmatprep.mubr.f32.mxu1 (!%p238_p2), %v3597_v0  ;;  %s3599_s10 = smov (!%p238_p2), 127   ;;  %v3405_v4 = vld [vmem:[%s4103_s2 + $0x8] sm:$0x3] (!%p238_p2)  ;;  %v3682_v9 = vld [vmem:[%s4102_s1] sm:$0xff] (!%p238_p2)  ;;  %v3692_v11 = vld [vmem:[%s4102_s1 + $0x18] sm:$0xff] (!%p238_p2) }
   0x7   : > { %v3675_v6 = vand.u32 (!%p238_p2), 127, %v297_v5  ;;  %v3687_v10 = vld [vmem:[%s4102_s1 + $0x8] sm:$0xff] (!%p238_p2)  ;;  %v3697_v13 = vld [vmem:[%s4102_s1 + $0x10] sm:$0xff] (!%p238_p2)  ;;  %v313_v23 = vld [vmem:[%s4103_s2] sm:$0x3] (!%p238_p2)  ;;  %v3600_v30 = vmov (!%p238_p2), 0  }
   0x8   : > { %v3404_v24 = vld [vmem:[%s4103_s2 + $0x6] sm:$0x3] (!%p238_p2)  ;;  %v3402_v25 = vld [vmem:[%s4103_s2 + $0x4] sm:$0x3] (!%p238_p2)  ;;  %v3408_v26 = vld [vmem:[%s4103_s2 + $0xa] sm:$0x3] (!%p238_p2)  ;;  %3587 = vset.pattern.permute.xlu0 (!%p238_p2), %v3600_v30  ;;  %3588 = vset.pattern.permute.xlu1 (!%p238_p2), %v3600_v30 }
   0x9   : > { %vm299_vm1 = vcmp.lt.s32.totalorder (!%p238_p2), %v3675_v6, 1  ;;  %vm308_vm2 = vcmp.lt.s32.totalorder (!%p238_p2), %v3675_v6, 127  ;;  %v3411_v27 = vld [vmem:[%s4103_s2 + $0xe] sm:$0x3] (!%p238_p2)  ;;  %v3410_v28 = vld [vmem:[%s4103_s2 + $0xc] sm:$0x3] (!%p238_p2) }
   0xa   : > { %v3414_v29 = vld [vmem:[%s4103_s2 + $0x10] sm:$0x3] (!%p238_p2)  ;;  %s3601_s17 = smov (!%p238_p2), 16   ;;  %v292_v33 = vld [vmem:[%s4107_s6] sm:$0x3] (!%p238_p2)  ;;  %s3602_s20 = smov (!%p238_p2), 112  }
   0xb   : > { %vm547_vm3 = vcmp.lt.s32.totalorder (!%p238_p2), %v3675_v6, 16  ;;  %v3761_v42 = vld [vmem:[%s4102_s1 + $0x20] sm:$0xff] (!%p238_p2)  ;;  %v3766_v43 = vld [vmem:[%s4102_s1 + $0x28] sm:$0xff] (!%p238_p2)  ;;  %vm1018_vm4 = vcmp.lt.s32.totalorder (!%p238_p2), %v3675_v6, 112  ;;  %v3774_v47 = vld [vmem:[%s4102_s1 + $0x30] sm:$0xff] (!%p238_p2)  ;;  %vm1060_vm5 = vcmask (!%p238_p2), 1041408  }
   0xc   : > { %v3779_v48 = vld [vmem:[%s4102_s1 + $0x38] sm:$0xff] (!%p238_p2)  ;;  %v3416_v63 = vld [vmem:[%s4104_s3 + $0x2] sm:$0x3] (!%p238_p2)  ;;  %vm1056_vm6 = vcmask (!%p238_p2), 15360   ;;  %vm1825_vm7 = vcmask (!%p238_p2), 1043456   ;;  %vm1821_vm8 = vcmask (!%p238_p2), 31744  }
   0xd   : > { %s4110_s25 = smov (!%p269_p3, %s3384_s25), 1  ;;  %vm2590_vm9 = vcmask 1045504   ;;  %vm2586_vm10 = vcmask 48128  }
   0xe   : > { %s3523_s26 = sshll.u32 %s4110_s25, 4 }
   0xf   : > { %s273_s29 = scalar_lea.vmem %s4101_s0, %s3523_s26  ;;  %s3792_s13 = scalar_lea.vmem %s4108_s7, %s3523_s26 }
  0x10   : > { %v290_v1 = vld [vmem:[%s273_s29] sm:$0xff]  ;;  %v291_v3 = vld [vmem:[%s273_s29 + $0x8] sm:$0xff] }
  0x11   : > { %293 = vrot.lane.b32.xlu0 %v290_v1, %s3598_s9  ;;  %304 = vrot.lane.b32.xlu1 %v290_v1, %s3599_s10 }
  0x12   : > { %320 = vmatprep.subr.mxu0 %v291_v3  ;;  %559 = vmatprep.subr.mxu1 %v291_v3 }
  0x13   : > { %321 = vmatpush1.msra.mxu0 %v290_v1  ;;  %560 = vmatpush1.msra.mxu1 %v290_v1 }
  0x14   : > { %3400 = vmatmul.mubr.msk.f32.vlgmr.msra.gmra.mrb[0].mxu0 %vm316_vm0, %v3399_v2  ;;  %3406 = vmatmul.mubr.msk.f32.vlgmr.msra.gmra.mrb[0].mxu1 %vm316_vm0, %v3405_v4  ;;  %v1036_v2 = vld [vmem:[%s4107_s6 + $0x2] sm:$0x3] }
  0x15   : > { %295 = vrot.lane.b32.xlu0 %v291_v3, %s3598_s9  ;;  %306 = vrot.lane.b32.xlu1 %v291_v3, %s3599_s10 }
  0x16   : > { %458 = vmatprep.mubr.f32.mxu0 %v3597_v0  ;;  %697 = vmatprep.mubr.f32.mxu1 %v3597_v0 }
  0x83   : > { %v294_v7 = vpop.permute.xlu0 %293  ;;  %v305_v8 = vpop.permute.xlu1 %304 }
  0x87   : > { %v296_v12 = vpop.permute.xlu0 %295  ;;  %v307_v14 = vpop.permute.xlu1 %306 }
  0x88   : > { %v300_v15 = vsel %vm299_vm1, %v294_v7, %v296_v12  ;;  %v301_v16 = vsel %vm299_vm1, %v296_v12, %v294_v7  ;;  %v309_v17 = vsel %vm308_vm2, %v305_v8, %v307_v14  ;;  %v310_v18 = vsel %vm308_vm2, %v307_v14, %v305_v8 }
  0x89   : > { %v302_v19 = vmul.f32 %v301_v16, %v3682_v9  ;;  %v303_v20 = vmul.f32 %v300_v15, %v3687_v10  ;;  %v312_v21 = vmul.f32 %v3692_v11, %v310_v18  ;;  %v311_v22 = vmul.f32 %v3697_v13, %v309_v17  ;;  %v1053_v15 = vld [vmem:[%s4104_s3] sm:$0x3]  ;;  %v3427_v16 = vld [vmem:[%s4104_s3 + $0x6] sm:$0x3] }
  0x8b   : > { %394 = vmatprep.subr.mxu0 %v303_v20  ;;  %633 = vmatprep.subr.mxu1 %v303_v20 }
  0x8c   : > { %395 = vmatpush1.msra.mxu0 %v302_v19  ;;  %634 = vmatpush1.msra.mxu1 %v302_v19 }
  0x8d   : > { %3401 = vmatmul.mubr.msk.f32.vlgmr.msra.gmra.mrb[0].mxu0 %vm316_vm0, %v313_v23  ;;  %470 = vmatprep.subr.mxu0 %v312_v21  ;;  %v3435_v23 = vld [vmem:[%s4104_s3 + $0xa] sm:$0x3] }
  0x8e   : > { %709 = vmatprep.subr.mxu1 %v312_v21  ;;  %471 = vmatpush1.msra.mxu0 %v311_v22 }
  0x8f   : > { %3407 = vmatmul.mubr.msk.f32.vlgmr.msra.gmra.mrb[0].mxu1 %vm316_vm0, %v3404_v24  ;;  %534 = vmatprep.mubr.f32.mxu0 %v3597_v0  ;;  %v3440_v24 = vld [vmem:[%s4104_s3 + $0xe] sm:$0x3] }
  0x90   : > { %710 = vmatpush1.msra.mxu1 %v311_v22  ;;  %791 = vmatprep.subr.mxu0 %v291_v3 }
  0x91   : > { %773 = vmatprep.mubr.f32.mxu1 %v3597_v0 }
  0x95   : > { %3403 = vmatmul.mubr.msk.f32.vlgmr.msra.gmra.mrb[0].mxu0 %vm316_vm0, %v3402_v25  ;;  %v3439_v25 = vld [vmem:[%s4104_s3 + $0xc] sm:$0x3] }
  0x96   : > { %792 = vmatpush1.msra.mxu0 %v290_v1  ;;  %855 = vmatprep.mubr.f32.mxu0 %v3597_v0  ;;  %v3428_v1 = vld [vmem:[%s4104_s3 + $0x8] sm:$0x3] }
  0x97   : > { %865 = vmatprep.subr.mxu0 %v303_v20  ;;  %3409 = vmatmul.mubr.msk.f32.vlgmr.msra.gmra.mrb[0].mxu1 %vm316_vm0, %v3408_v26  ;;  %v3447_v26 = vld [vmem:[%s4104_s3 + $0x10] sm:$0x3] }
  0x98   : > { %1131 = vmatprep.mubr.f32.mxu1 %v3597_v0 }
  0x99   : > { %3412 = vmatmul.mubr.msk.f32.vlgmr.msra.gmra.mrb[2].mxu0 %vm316_vm0, %v3411_v27 }
  0x9a   : > { %866 = vmatpush1.msra.mxu0 %v302_v19  ;;  %929 = vmatprep.mubr.f32.mxu0 %v3597_v0 }
  0x9b   : > { %941 = vmatprep.subr.mxu0 %v312_v21 }
  0xa1   : > { %3413 = vmatmul.mubr.msk.f32.vlgmr.msra.gmra.mrb[2].mxu0 %vm316_vm0, %v3410_v28 }
  0xa2   : > { %942 = vmatpush1.msra.mxu0 %v311_v22  ;;  %1005 = vmatprep.mubr.f32.mxu0 %v3597_v0  ;;  %v3423_v22 = vld [vmem:[%s4104_s3 + $0x4] sm:$0x3] }
  0xa9   : > { %3415 = vmatmul.mubr.msk.f32.vlgmr.msra.gmra.mrb[2].mxu0 %vm316_vm0, %v3414_v29 }
  0xaa   : > { %1381 = vmatprep.mubr.f32.mxu0 %v3597_v0 }
 0x168   : > { %v536_v31 = vpop.f32.mrb[0].mxu0 }
 0x169   : > { %543 = vrot.lane.b32.xlu0 %v536_v31, %s3601_s17  ;;  %v538_v32 = vpop.f32.mrb[1].mxu0 }
 0x16a   : > { %545 = vrot.lane.b32.xlu1 %v538_v32, %s3601_s17  ;;  %v775_v34 = vpop.f32.mrb[0].mxu1 }
 0x16b   : > { %v777_v35 = vpop.f32.mrb[1].mxu1 }
 0x16d   : > { %1027 = vperm.xlu0 %3587, %v292_v33  }
 0x17c   : > { %v1007_v36 = vpop.f32.mrb[2].mxu0 }
 0x17d   : > { %1014 = vrot.lane.b32.xlu1 %v1007_v36, %s3602_s20  ;;  %v1009_v37 = vpop.f32.mrb[3].mxu0 }
 0x181   : > { %1016 = vrot.lane.b32.xlu1 %v1009_v37, %s3602_s20 }
 0x1db   : > { %v544_v38 = vpop.permute.xlu0 %543 }
 0x1dc   : > { %v546_v39 = vpop.permute.xlu1 %545 }
 0x1dd   : > { %v548_v40 = vsel %vm547_vm3, %v544_v38, %v546_v39  ;;  %v549_v41 = vsel %vm547_vm3, %v546_v39, %v544_v38 }
 0x1de   : > { %v550_v45 = vmul.f32 %v3761_v42, %v549_v41  ;;  %v551_v46 = vmul.f32 %v3766_v43, %v548_v40 }
 0x1e0   : > { %v782_v52 = vadd.f32 %v775_v34, %v550_v45  ;;  %v783_v53 = vadd.f32 %v777_v35, %v551_v46 }
 0x1ec   : > { %v1028_v56 = vpop.permute.xlu0 %1027 }
 0x1ef   : > { %v1015_v44 = vpop.permute.xlu1 %1014 }
 0x1f3   : > { %v1017_v49 = vpop.permute.xlu1 %1016 }
 0x1f4   : > { %v1019_v50 = vsel %vm1018_vm4, %v1015_v44, %v1017_v49  ;;  %v1020_v51 = vsel %vm1018_vm4, %v1017_v49, %v1015_v44 }
 0x1f5   : > { %v1021_v54 = vmul.f32 %v3774_v47, %v1019_v50  ;;  %v1022_v55 = vmul.f32 %v3779_v48, %v1020_v51 }
 0x1f7   : > { %v1023_v57 = vadd.f32 %v1021_v54, %v782_v52  ;;  %v1024_v58 = vadd.f32 %v1022_v55, %v783_v53 }
 0x1f9   : > { %v1030_v59 = vadd.f32 %v1028_v56, %v1023_v57  ;;  %v1031_v60 = vadd.f32 %v1028_v56, %v1024_v58 }
 0x1fb   : > { %v1032_v61 = vmax.f32 %v1030_v59, 0.0  ;;  %v1033_v62 = vmax.f32 %v1031_v60, 0.0 }
 0x1fd   : > { %1034 = vst [vmem:[%s3792_s13] sm:$0x3] %v1032_v61  ;;  %1035 = vst [vmem:[%s3792_s13 + $0x8] sm:$0x3] %v1033_v62  ;;  %1039 = vrot.lane.b32.xlu1 %v1033_v62, %s3598_s9  ;;  %3417 = vmatprep.subr.msk.mxu1 %vm1060_vm5, %v1033_v62 }
 0x1fe   : > { %3429 = vmatprep.subr.msk.mxu0 %vm1060_vm5, %v1033_v62  ;;  %1037 = vrot.lane.b32.xlu0 %v1032_v61, %s3598_s9 }
 0x1ff   : > { %3418 = vmatpush1.msk.msra.mxu1 %vm1060_vm5, %v1032_v61  ;;  %3430 = vmatpush1.msk.msra.mxu0 %vm1060_vm5, %v1032_v61 }
 0x200   : > { %3419 = vmatmul.mubr.msk.f32.vlgmr.msra.gmra.mrb[2].mxu1 %vm1056_vm6, %v3416_v63  ;;  %3431 = vmatmul.mubr.msk.f32.vlgmr.msra.gmra.mrb[4].mxu0 %vm1056_vm6, %v3428_v1  ;;  %v3463_v63 = vld [vmem:[%s4105_s4 + $0x8] sm:$0x3]  ;;  %v1801_v1 = vld [vmem:[%s4107_s6 + $0x4] sm:$0x3] }
 0x201   : > { %1047 = vrot.lane.b32.xlu1 %v1033_v62, %s3599_s10  ;;  %1211 = vmatprep.mubr.f32.mxu1 %v3597_v0 }
 0x202   : > { %1045 = vrot.lane.b32.xlu0 %v1032_v61, %s3599_s10  ;;  %1455 = vmatprep.mubr.f32.mxu0 %v3597_v0 }
 0x206   : > { %1784 = vperm.xlu0 %3587, %v1036_v2  }
 0x26f   : > { %v1040_v3 = vpop.permute.xlu1 %1039 }
 0x270   : > { %v1038_v4 = vpop.permute.xlu0 %1037 }
 0x271   : > { %v1041_v5 = vsel %vm299_vm1, %v1038_v4, %v1040_v3  ;;  %v1042_v7 = vsel %vm299_vm1, %v1040_v3, %v1038_v4 }
 0x272   : > { %v1043_v8 = vmul.f32 %v1042_v7, %v3682_v9  ;;  %v1044_v12 = vmul.f32 %v1041_v5, %v3687_v10 }
 0x273   : > { %v1048_v14 = vpop.permute.xlu1 %1047 }
 0x274   : > { %v1046_v17 = vpop.permute.xlu0 %1045  ;;  %3420 = vmatprep.subr.msk.mxu1 %vm1060_vm5, %v1044_v12  ;;  %3432 = vmatprep.subr.msk.mxu0 %vm1060_vm5, %v1044_v12 }
 0x275   : > { %v1049_v18 = vsel %vm308_vm2, %v1046_v17, %v1048_v14  ;;  %v1050_v19 = vsel %vm308_vm2, %v1048_v14, %v1046_v17  ;;  %3421 = vmatpush1.msk.msra.mxu1 %vm1060_vm5, %v1043_v8  ;;  %3433 = vmatpush1.msk.msra.mxu0 %vm1060_vm5, %v1043_v8  ;;  %v1818_v14 = vld [vmem:[%s4105_s4] sm:$0x3] }
 0x276   : > { %v1051_v20 = vmul.f32 %v3697_v13, %v1049_v18  ;;  %v1052_v21 = vmul.f32 %v3692_v11, %v1050_v19  ;;  %3422 = vmatmul.mubr.msk.f32.vlgmr.msra.gmra.mrb[2].mxu1 %vm1056_vm6, %v1053_v15  ;;  %3434 = vmatmul.mubr.msk.f32.vlgmr.msra.gmra.mrb[4].mxu0 %vm1056_vm6, %v3427_v16  ;;  %v3462_v15 = vld [vmem:[%s4105_s4 + $0x6] sm:$0x3] }
 0x277   : > { %1293 = vmatprep.mubr.f32.mxu1 %v3597_v0  ;;  %1531 = vmatprep.mubr.f32.mxu0 %v3597_v0 }
 0x278   : > { %3424 = vmatprep.subr.msk.mxu1 %vm1060_vm5, %v1052_v21  ;;  %3436 = vmatprep.subr.msk.mxu0 %vm1060_vm5, %v1052_v21 }
 0x279   : > { %3425 = vmatpush1.msk.msra.mxu1 %vm1060_vm5, %v1051_v20  ;;  %3437 = vmatpush1.msk.msra.mxu0 %vm1060_vm5, %v1051_v20 }
 0x27a   : > { %3441 = vmatprep.subr.msk.mxu1 %vm1060_vm5, %v1033_v62  ;;  %v3451_v62 = vld [vmem:[%s4105_s4 + $0x2] sm:$0x3] }
 0x27e   : > { %3426 = vmatmul.mubr.msk.f32.vlgmr.msra.gmra.mrb[2].mxu1 %vm1056_vm6, %v3423_v22  ;;  %3438 = vmatmul.mubr.msk.f32.vlgmr.msra.gmra.mrb[4].mxu0 %vm1056_vm6, %v3435_v23  ;;  %v3470_v22 = vld [vmem:[%s4105_s4 + $0xa] sm:$0x3]  ;;  %v3475_v23 = vld [vmem:[%s4105_s4 + $0xe] sm:$0x3] }
 0x27f   : > { %3442 = vmatpush1.msk.msra.mxu1 %vm1060_vm5, %v1032_v61  ;;  %1613 = vmatprep.mubr.f32.mxu1 %v3597_v0 }
 0x280   : > { %3444 = vmatprep.subr.msk.mxu1 %vm1060_vm5, %v1044_v12  ;;  %1896 = vmatprep.mubr.f32.mxu0 %v3597_v0 }
 0x282   : > { %3443 = vmatmul.mubr.msk.f32.vlgmr.msra.gmra.mrb[4].mxu1 %vm1056_vm6, %v3440_v24  ;;  %v3474_v24 = vld [vmem:[%s4105_s4 + $0xc] sm:$0x3] }
 0x283   : > { %3445 = vmatpush1.msk.msra.mxu1 %vm1060_vm5, %v1043_v8  ;;  %1687 = vmatprep.mubr.f32.mxu1 %v3597_v0 }
 0x284   : > { %3448 = vmatprep.subr.msk.mxu1 %vm1060_vm5, %v1052_v21  ;;  %v3458_v21 = vld [vmem:[%s4105_s4 + $0x4] sm:$0x3] }
 0x285   : > { %v1785_v33 = vpop.permute.xlu0 %1784 }
 0x28a   : > { %3446 = vmatmul.mubr.msk.f32.vlgmr.msra.gmra.mrb[4].mxu1 %vm1056_vm6, %v3439_v25  ;;  %v3482_v25 = vld [vmem:[%s4105_s4 + $0x10] sm:$0x3] }
 0x28b   : > { %3449 = vmatpush1.msk.msra.mxu1 %vm1060_vm5, %v1051_v20  ;;  %1763 = vmatprep.mubr.f32.mxu1 %v3597_v0 }
 0x292   : > { %3450 = vmatmul.mubr.msk.f32.vlgmr.msra.gmra.mrb[4].mxu1 %vm1056_vm6, %v3447_v26 }
 0x293   : > { %2146 = vmatprep.mubr.f32.mxu1 %v3597_v0 }
 0x351   : > { %v1295_v27 = vpop.f32.mrb[2].mxu1  ;;  %v1533_v28 = vpop.f32.mrb[4].mxu0 }
 0x352   : > { %1302 = vrot.lane.b32.xlu0 %v1295_v27, %s3601_s17  ;;  %v1297_v29 = vpop.f32.mrb[3].mxu1  ;;  %v1535_v30 = vpop.f32.mrb[5].mxu0 }
 0x353   : > { %1304 = vrot.lane.b32.xlu1 %v1297_v29, %s3601_s17 }
 0x365   : > { %v1765_v31 = vpop.f32.mrb[4].mxu1 }
 0x366   : > { %1772 = vrot.lane.b32.xlu1 %v1765_v31, %s3602_s20  ;;  %v1767_v32 = vpop.f32.mrb[5].mxu1 }
 0x367   : > { %1774 = vrot.lane.b32.xlu0 %v1767_v32, %s3602_s20 }
 0x3c4   : > { %v1303_v34 = vpop.permute.xlu0 %1302 }
 0x3c5   : > { %v1305_v35 = vpop.permute.xlu1 %1304 }
 0x3c6   : > { %v1306_v36 = vsel %vm547_vm3, %v1303_v34, %v1305_v35  ;;  %v1307_v37 = vsel %vm547_vm3, %v1305_v35, %v1303_v34 }
 0x3c7   : > { %v1308_v38 = vmul.f32 %v3761_v42, %v1307_v37  ;;  %v1309_v39 = vmul.f32 %v3766_v43, %v1306_v36 }
 0x3c9   : > { %v1540_v46 = vadd.f32 %v1533_v28, %v1308_v38  ;;  %v1541_v49 = vadd.f32 %v1535_v30, %v1309_v39 }
 0x3d8   : > { %v1773_v40 = vpop.permute.xlu1 %1772 }
 0x3d9   : > { %v1775_v41 = vpop.permute.xlu0 %1774 }
 0x3da   : > { %v1776_v44 = vsel %vm1018_vm4, %v1773_v40, %v1775_v41  ;;  %v1777_v45 = vsel %vm1018_vm4, %v1775_v41, %v1773_v40 }
 0x3db   : > { %v1778_v50 = vmul.f32 %v3774_v47, %v1776_v44  ;;  %v1779_v51 = vmul.f32 %v3779_v48, %v1777_v45 }
 0x3dd   : > { %v1780_v52 = vadd.f32 %v1778_v50, %v1540_v46  ;;  %v1781_v53 = vadd.f32 %v1779_v51, %v1541_v49 }
 0x3df   : > { %v1787_v54 = vadd.f32 %v1785_v33, %v1780_v52  ;;  %v1788_v55 = vadd.f32 %v1785_v33, %v1781_v53 }
 0x3e1   : > { %v1789_v56 = vmax.f32 %v1787_v54, 0.0  ;;  %v1790_v57 = vmax.f32 %v1788_v55, 0.0 }
 0x3e3   : > { %v1793_v58 = vrot.slane %v1789_v56, 6  ;;  %v1794_v59 = vrot.slane %v1790_v57, 6 }
 0x3e5   : > { %1797 = vst [vmem:[%s3792_s13] sm:$0xc] %v1793_v58  ;;  %1798 = vst [vmem:[%s3792_s13 + $0x8] sm:$0xc] %v1794_v59 }
 0x3ec   : > { %v1800_v60 = vld [vmem:[%s3792_s13 + $0x8] sm:$0xf]  ;;  %v1799_v61 = vld [vmem:[%s3792_s13] sm:$0xf] }
 0x3ed   : > { %1804 = vrot.lane.b32.xlu0 %v1800_v60, %s3598_s9  ;;  %3452 = vmatprep.subr.msk.mxu0 %vm1825_vm7, %v1800_v60 }
 0x3ee   : > { %3464 = vmatprep.subr.msk.mxu1 %vm1825_vm7, %v1800_v60  ;;  %1802 = vrot.lane.b32.xlu1 %v1799_v61, %s3598_s9 }
 0x3ef   : > { %3453 = vmatpush1.msk.msra.mxu0 %vm1825_vm7, %v1799_v61  ;;  %3465 = vmatpush1.msk.msra.mxu1 %vm1825_vm7, %v1799_v61 }
 0x3f0   : > { %3454 = vmatmul.mubr.msk.f32.vlgmr.msra.gmra.mrb[6].mxu0 %vm1821_vm8, %v3451_v62  ;;  %3466 = vmatmul.mubr.msk.f32.vlgmr.msra.gmra.mrb[6].mxu1 %vm1821_vm8, %v3463_v63  ;;  %v3498_v62 = vld [vmem:[%s4106_s5 + $0x8] sm:$0x3]  ;;  %v2566_v63 = vld [vmem:[%s4107_s6 + $0x6] sm:$0x3] }
 0x3f1   : > { %1812 = vrot.lane.b32.xlu0 %v1800_v60, %s3599_s10  ;;  %1976 = vmatprep.mubr.f32.mxu0 %v3597_v0 }
 0x3f2   : > { %1810 = vrot.lane.b32.xlu1 %v1799_v61, %s3599_s10  ;;  %2220 = vmatprep.mubr.f32.mxu1 %v3597_v0 }
 0x3f6   : > { %2549 = vperm.xlu1 %3588, %v1801_v1  }
 0x45f   : > { %v1805_v2 = vpop.permute.xlu0 %1804 }
 0x460   : > { %v1803_v3 = vpop.permute.xlu1 %1802 }
 0x461   : > { %v1806_v4 = vsel %vm299_vm1, %v1803_v3, %v1805_v2  ;;  %v1807_v5 = vsel %vm299_vm1, %v1805_v2, %v1803_v3 }
 0x462   : > { %v1808_v7 = vmul.f32 %v1807_v5, %v3682_v9  ;;  %v1809_v8 = vmul.f32 %v1806_v4, %v3687_v10 }
 0x463   : > { %v1813_v12 = vpop.permute.xlu0 %1812 }
 0x464   : > { %v1811_v16 = vpop.permute.xlu1 %1810  ;;  %3455 = vmatprep.subr.msk.mxu0 %vm1825_vm7, %v1809_v8  ;;  %3467 = vmatprep.subr.msk.mxu1 %vm1825_vm7, %v1809_v8 }
 0x465   : > { %v1814_v17 = vsel %vm308_vm2, %v1811_v16, %v1813_v12  ;;  %v1815_v18 = vsel %vm308_vm2, %v1813_v12, %v1811_v16  ;;  %3456 = vmatpush1.msk.msra.mxu0 %vm1825_vm7, %v1808_v7  ;;  %3468 = vmatpush1.msk.msra.mxu1 %vm1825_vm7, %v1808_v7  ;;  %v2583_v12 = vld [vmem:[%s4106_s5] sm:$0x3] }
 0x466   : > { %v1816_v19 = vmul.f32 %v3697_v13, %v1814_v17  ;;  %v1817_v20 = vmul.f32 %v3692_v11, %v1815_v18  ;;  %3457 = vmatmul.mubr.msk.f32.vlgmr.msra.gmra.mrb[6].mxu0 %vm1821_vm8, %v1818_v14  ;;  %3469 = vmatmul.mubr.msk.f32.vlgmr.msra.gmra.mrb[6].mxu1 %vm1821_vm8, %v3462_v15  ;;  %v3497_v14 = vld [vmem:[%s4106_s5 + $0x6] sm:$0x3]  ;;  %v3510_v18 = vld [vmem:[%s4106_s5 + $0xe] sm:$0x3] }
 0x467   : > { %2058 = vmatprep.mubr.f32.mxu0 %v3597_v0  ;;  %2296 = vmatprep.mubr.f32.mxu1 %v3597_v0 }
 0x468   : > { %3459 = vmatprep.subr.msk.mxu0 %vm1825_vm7, %v1817_v20  ;;  %3471 = vmatprep.subr.msk.mxu1 %vm1825_vm7, %v1817_v20 }
 0x469   : > { %3460 = vmatpush1.msk.msra.mxu0 %vm1825_vm7, %v1816_v19  ;;  %3472 = vmatpush1.msk.msra.mxu1 %vm1825_vm7, %v1816_v19 }
 0x46a   : > { %3476 = vmatprep.subr.msk.mxu0 %vm1825_vm7, %v1800_v60 }
 0x46e   : > { %3461 = vmatmul.mubr.msk.f32.vlgmr.msra.gmra.mrb[6].mxu0 %vm1821_vm8, %v3458_v21  ;;  %3473 = vmatmul.mubr.msk.f32.vlgmr.msra.gmra.mrb[6].mxu1 %vm1821_vm8, %v3470_v22 }
 0x46f   : > { %3477 = vmatpush1.msk.msra.mxu0 %vm1825_vm7, %v1799_v61  ;;  %2378 = vmatprep.mubr.f32.mxu0 %v3597_v0  ;;  %v3486_v61 = vld [vmem:[%s4106_s5 + $0x2] sm:$0x3] }
 0x470   : > { %3479 = vmatprep.subr.msk.mxu0 %vm1825_vm7, %v1809_v8  ;;  %2661 = vmatprep.mubr.f32.mxu1 %v3597_v0 }
 0x472   : > { %3478 = vmatmul.mubr.msk.f32.vlgmr.msra.gmra.mrb[8].mxu0 %vm1821_vm8, %v3475_v23 }
 0x473   : > { %3480 = vmatpush1.msk.msra.mxu0 %vm1825_vm7, %v1808_v7  ;;  %2452 = vmatprep.mubr.f32.mxu0 %v3597_v0 }
 0x474   : > { %3483 = vmatprep.subr.msk.mxu0 %vm1825_vm7, %v1817_v20  ;;  %v3517_v20 = vld [vmem:[%s4106_s5 + $0x10] sm:$0x3] }
 0x475   : > { %v2550_v32 = vpop.permute.xlu1 %2549 }
 0x47a   : > { %3481 = vmatmul.mubr.msk.f32.vlgmr.msra.gmra.mrb[8].mxu0 %vm1821_vm8, %v3474_v24 }
 0x47b   : > { %3484 = vmatpush1.msk.msra.mxu0 %vm1825_vm7, %v1816_v19  ;;  %2528 = vmatprep.mubr.f32.mxu0 %v3597_v0  ;;  %v3509_v19 = vld [vmem:[%s4106_s5 + $0xc] sm:$0x3] }
 0x482   : > { %3485 = vmatmul.mubr.msk.f32.vlgmr.msra.gmra.mrb[8].mxu0 %vm1821_vm8, %v3482_v25 }
 0x483   : > { %2911 = vmatprep.mubr.f32.mxu0 %v3597_v0 }
 0x541   : > { %v2060_v26 = vpop.f32.mrb[6].mxu0  ;;  %v2298_v27 = vpop.f32.mrb[6].mxu1 }
 0x542   : > { %2067 = vrot.lane.b32.xlu1 %v2060_v26, %s3601_s17  ;;  %v2062_v28 = vpop.f32.mrb[7].mxu0  ;;  %v2300_v29 = vpop.f32.mrb[7].mxu1 }
 0x543   : > { %2069 = vrot.lane.b32.xlu0 %v2062_v28, %s3601_s17 }
 0x555   : > { %v2530_v30 = vpop.f32.mrb[8].mxu0 }
 0x556   : > { %2537 = vrot.lane.b32.xlu0 %v2530_v30, %s3602_s20  ;;  %v2532_v31 = vpop.f32.mrb[9].mxu0 }
 0x557   : > { %2539 = vrot.lane.b32.xlu1 %v2532_v31, %s3602_s20 }
 0x5b4   : > { %v2068_v33 = vpop.permute.xlu1 %2067 }
 0x5b5   : > { %v2070_v34 = vpop.permute.xlu0 %2069 }
 0x5b6   : > { %v2071_v35 = vsel %vm547_vm3, %v2068_v33, %v2070_v34  ;;  %v2072_v36 = vsel %vm547_vm3, %v2070_v34, %v2068_v33 }
 0x5b7   : > { %v2073_v37 = vmul.f32 %v3761_v42, %v2072_v36  ;;  %v2074_v38 = vmul.f32 %v3766_v43, %v2071_v35 }
 0x5b9   : > { %v2305_v45 = vadd.f32 %v2298_v27, %v2073_v37  ;;  %v2306_v46 = vadd.f32 %v2300_v29, %v2074_v38 }
 0x5c8   : > { %v2538_v39 = vpop.permute.xlu0 %2537 }
 0x5c9   : > { %v2540_v40 = vpop.permute.xlu1 %2539 }
 0x5ca   : > { %v2541_v41 = vsel %vm1018_vm4, %v2538_v39, %v2540_v40  ;;  %v2542_v44 = vsel %vm1018_vm4, %v2540_v40, %v2538_v39 }
 0x5cb   : > { %v2543_v49 = vmul.f32 %v3774_v47, %v2541_v41  ;;  %v2544_v50 = vmul.f32 %v3779_v48, %v2542_v44 }
 0x5cd   : > { %v2545_v51 = vadd.f32 %v2543_v49, %v2305_v45  ;;  %v2546_v52 = vadd.f32 %v2544_v50, %v2306_v46 }
 0x5cf   : > { %v2552_v53 = vadd.f32 %v2550_v32, %v2545_v51  ;;  %v2553_v54 = vadd.f32 %v2550_v32, %v2546_v52 }
 0x5d1   : > { %v2554_v55 = vmax.f32 %v2552_v53, 0.0  ;;  %v2555_v56 = vmax.f32 %v2553_v54, 0.0 }
 0x5d3   : > { %v2558_v57 = vrot.slane %v2554_v55, 4  ;;  %v2559_v58 = vrot.slane %v2555_v56, 4 }
 0x5d5   : > { %2562 = vst [vmem:[%s3792_s13] sm:$0x30] %v2558_v57  ;;  %2563 = vst [vmem:[%s3792_s13 + $0x8] sm:$0x30] %v2559_v58 }
 0x5dc   : > { %v2565_v59 = vld [vmem:[%s3792_s13 + $0x8] sm:$0x3f]  ;;  %v2564_v60 = vld [vmem:[%s3792_s13] sm:$0x3f] }
 0x5dd   : > { %2569 = vrot.lane.b32.xlu1 %v2565_v59, %s3598_s9  ;;  %3487 = vmatprep.subr.msk.mxu1 %vm2590_vm9, %v2565_v59 }
 0x5de   : > { %3499 = vmatprep.subr.msk.mxu0 %vm2590_vm9, %v2565_v59  ;;  %2567 = vrot.lane.b32.xlu0 %v2564_v60, %s3598_s9 }
 0x5df   : > { %3488 = vmatpush1.msk.msra.mxu1 %vm2590_vm9, %v2564_v60  ;;  %3500 = vmatpush1.msk.msra.mxu0 %vm2590_vm9, %v2564_v60 }
 0x5e0   : > { %3489 = vmatmul.mubr.msk.f32.vlgmr.msra.gmra.mrb[8].mxu1 %vm2586_vm10, %v3486_v61  ;;  %3501 = vmatmul.mubr.msk.f32.vlgmr.msra.gmra.mrb[10].mxu0 %vm2586_vm10, %v3498_v62 }
 0x5e1   : > { %2577 = vrot.lane.b32.xlu1 %v2565_v59, %s3599_s10  ;;  %2741 = vmatprep.mubr.f32.mxu1 %v3597_v0 }
 0x5e2   : > { %2575 = vrot.lane.b32.xlu0 %v2564_v60, %s3599_s10  ;;  %2985 = vmatprep.mubr.f32.mxu0 %v3597_v0 }
 0x5e6   : > { %3314 = vperm.xlu0 %3587, %v2566_v63  }
 0x64f   : > { %v2570_v1 = vpop.permute.xlu1 %2569 }
 0x650   : > { %v2568_v2 = vpop.permute.xlu0 %2567 }
 0x651   : > { %v2571_v3 = vsel %vm299_vm1, %v2568_v2, %v2570_v1  ;;  %v2572_v4 = vsel %vm299_vm1, %v2570_v1, %v2568_v2 }
 0x652   : > { %v2573_v5 = vmul.f32 %v2572_v4, %v3682_v9  ;;  %v2574_v7 = vmul.f32 %v2571_v3, %v3687_v10 }
 0x653   : > { %v2578_v8 = vpop.permute.xlu1 %2577 }
 0x654   : > { %v2576_v15 = vpop.permute.xlu0 %2575  ;;  %3490 = vmatprep.subr.msk.mxu1 %vm2590_vm9, %v2574_v7  ;;  %3502 = vmatprep.subr.msk.mxu0 %vm2590_vm9, %v2574_v7 }
 0x655   : > { %v2579_v16 = vsel %vm308_vm2, %v2576_v15, %v2578_v8  ;;  %v2580_v9 = vsel %vm308_vm2, %v2578_v8, %v2576_v15  ;;  %3491 = vmatpush1.msk.msra.mxu1 %vm2590_vm9, %v2573_v5  ;;  %3503 = vmatpush1.msk.msra.mxu0 %vm2590_vm9, %v2573_v5 }
 0x656   : > { %v2581_v10 = vmul.f32 %v3697_v13, %v2579_v16  ;;  %v2582_v17 = vmul.f32 %v3692_v11, %v2580_v9  ;;  %3492 = vmatmul.mubr.msk.f32.vlgmr.msra.gmra.mrb[8].mxu1 %vm2586_vm10, %v2583_v12  ;;  %3504 = vmatmul.mubr.msk.f32.vlgmr.msra.gmra.mrb[10].mxu0 %vm2586_vm10, %v3497_v14  ;;  %v3493_v11 = vld [vmem:[%s4106_s5 + $0x4] sm:$0x3]  ;;  %v3505_v13 = vld [vmem:[%s4106_s5 + $0xa] sm:$0x3] }
 0x657   : > { %2823 = vmatprep.mubr.f32.mxu1 %v3597_v0  ;;  %3061 = vmatprep.mubr.f32.mxu0 %v3597_v0 }
 0x658   : > { %3494 = vmatprep.subr.msk.mxu1 %vm2590_vm9, %v2582_v17  ;;  %3506 = vmatprep.subr.msk.mxu0 %vm2590_vm9, %v2582_v17 }
 0x659   : > { %3495 = vmatpush1.msk.msra.mxu1 %vm2590_vm9, %v2581_v10  ;;  %3507 = vmatpush1.msk.msra.mxu0 %vm2590_vm9, %v2581_v10 }
 0x65a   : > { %3511 = vmatprep.subr.msk.mxu1 %vm2590_vm9, %v2565_v59 }
 0x65e   : > { %3496 = vmatmul.mubr.msk.f32.vlgmr.msra.gmra.mrb[8].mxu1 %vm2586_vm10, %v3493_v11  ;;  %3508 = vmatmul.mubr.msk.f32.vlgmr.msra.gmra.mrb[10].mxu0 %vm2586_vm10, %v3505_v13 }
 0x65f   : > { %3512 = vmatpush1.msk.msra.mxu1 %vm2590_vm9, %v2564_v60  ;;  %3143 = vmatprep.mubr.f32.mxu1 %v3597_v0 }
 0x660   : > { %3514 = vmatprep.subr.msk.mxu1 %vm2590_vm9, %v2574_v7 }
 0x662   : > { %3513 = vmatmul.mubr.msk.f32.vlgmr.msra.gmra.mrb[10].mxu1 %vm2586_vm10, %v3510_v18 }
 0x663   : > { %3515 = vmatpush1.msk.msra.mxu1 %vm2590_vm9, %v2573_v5  ;;  %3217 = vmatprep.mubr.f32.mxu1 %v3597_v0 }
 0x664   : > { %3518 = vmatprep.subr.msk.mxu1 %vm2590_vm9, %v2582_v17 }
 0x66a   : > { %3516 = vmatmul.mubr.msk.f32.vlgmr.msra.gmra.mrb[10].mxu1 %vm2586_vm10, %v3509_v19 }
 0x66b   : > { %3519 = vmatpush1.msk.msra.mxu1 %vm2590_vm9, %v2581_v10  ;;  %3293 = vmatprep.mubr.f32.mxu1 %v3597_v0  ;;  %v3315_v0 = vpop.permute.xlu0 %3314 }
 0x672   : > { %3520 = vmatmul.mubr.msk.f32.vlgmr.msra.gmra.mrb[10].mxu1 %vm2586_vm10, %v3517_v20 }
 0x731   : > { %v2825_v21 = vpop.f32.mrb[8].mxu1  ;;  %v3063_v22 = vpop.f32.mrb[10].mxu0 }
 0x732   : > { %2832 = vrot.lane.b32.xlu0 %v2825_v21, %s3601_s17  ;;  %v2827_v23 = vpop.f32.mrb[9].mxu1  ;;  %v3065_v24 = vpop.f32.mrb[11].mxu0 }
 0x733   : > { %2834 = vrot.lane.b32.xlu1 %v2827_v23, %s3601_s17 }
 0x745   : > { %v3295_v25 = vpop.f32.mrb[10].mxu1 }
 0x746   : > { %3302 = vrot.lane.b32.xlu1 %v3295_v25, %s3602_s20  ;;  %v3297_v26 = vpop.f32.mrb[11].mxu1 }
 0x747   : > { %3304 = vrot.lane.b32.xlu0 %v3297_v26, %s3602_s20 }
 0x7a4   : > { %v2833_v27 = vpop.permute.xlu0 %2832 }
 0x7a5   : > { %v2835_v28 = vpop.permute.xlu1 %2834 }
 0x7a6   : > { %v2836_v29 = vsel %vm547_vm3, %v2833_v27, %v2835_v28  ;;  %v2837_v30 = vsel %vm547_vm3, %v2835_v28, %v2833_v27 }
 0x7a7   : > { %v2838_v31 = vmul.f32 %v3761_v42, %v2837_v30  ;;  %v2839_v32 = vmul.f32 %v3766_v43, %v2836_v29 }
 0x7a9   : > { %v3070_v37 = vadd.f32 %v3063_v22, %v2838_v31  ;;  %v3071_v38 = vadd.f32 %v3065_v24, %v2839_v32 }
 0x7b8   : > { %v3303_v33 = vpop.permute.xlu1 %3302 }
 0x7b9   : > { %v3305_v34 = vpop.permute.xlu0 %3304 }
 0x7ba   : > { %v3306_v35 = vsel %vm1018_vm4, %v3303_v33, %v3305_v34  ;;  %v3307_v36 = vsel %vm1018_vm4, %v3305_v34, %v3303_v33 }
 0x7bb   : > { %v3308_v39 = vmul.f32 %v3774_v47, %v3306_v35  ;;  %v3309_v40 = vmul.f32 %v3779_v48, %v3307_v36 }
 0x7bd   : > { %v3310_v41 = vadd.f32 %v3308_v39, %v3070_v37  ;;  %v3311_v42 = vadd.f32 %v3309_v40, %v3071_v38 }
 0x7bf   : > { %v3317_v44 = vadd.f32 %v3315_v0, %v3310_v41  ;;  %v3318_v43 = vadd.f32 %v3315_v0, %v3311_v42 }
 0x7c1   : > { %v3319_v45 = vmax.f32 %v3317_v44, 0.0  ;;  %v3320_v46 = vmax.f32 %v3318_v43, 0.0 }
 0x7c3   : > { %v3323_v49 = vrot.slane %v3319_v45, 2  ;;  %v3324_v50 = vrot.slane %v3320_v46, 2 }
 0x7c5   : > { %3327 = vst [vmem:[%s3792_s13] sm:$0xc0] %v3323_v49  ;;  %3328 = vst [vmem:[%s3792_s13 + $0x8] sm:$0xc0] %v3324_v50 }
 0x7c6 PF: > { %s17_s24 = sadd.s32 1, %s3595_s24  }
 0x7c7   : > { %p14_p4 = scmp.ge.s32.totalorder %s17_s24, 4  }
 0x7c9   :  { %16 = sbr.rel (!%p14_p4) target bundleno = 1 (0x1), region = 113 }

</bundles_post_ra>
